<compile_context>
chip_gen: v7x
topology: tpu7x:2x2x1
jax: 0.10.0
libtpu: 0.0.40
codegen_flags: <defaults>
</compile_context>

<pallas_src>
import jax
import jax.numpy as jnp
from jax.experimental import pallas as pl
from jax.experimental.pallas import tpu as pltpu

N_STATES = 225      # AlphaFive observation_space (15*15)
N_ACTIONS = 225     # AlphaFive action_space
N_PAD = 256         # lane-dense padding of the 225-wide dims
H1 = 1024
H2 = 512
DEFAULT_TILE_B = 256


def _round_up(x, m):
    return (x + m - 1) // m * m


def mlp_kernel(x_ref, w1_ref, b1_ref, w2_ref, b2_ref, w3_ref, b3_ref, out_ref):
    # fc1 + ReLU  (x is bf16, zero-padded to 256 lanes; accumulate in f32)
    h = jnp.dot(x_ref[...], w1_ref[...], preferred_element_type=jnp.float32)
    h = jnp.maximum(h + b1_ref[...], 0.0)

    # fc2 + ReLU
    h = jnp.dot(h.astype(jnp.bfloat16), w2_ref[...],
                preferred_element_type=jnp.float32)
    h = jnp.maximum(h + b2_ref[...], 0.0)

    # out layer (no activation); output tile is lane-dense (TILE_B, 256)
    h = jnp.dot(h.astype(jnp.bfloat16), w3_ref[...],
                preferred_element_type=jnp.float32)
    out_ref[...] = (h + b3_ref[...]).astype(out_ref.dtype)


def net_forward(x, prep_params, tile_b=None):
    """x: (B, N_STATES) f32; prep_params: output of prepare_params()."""
    w1, b1, w2, b2, w3, b3 = prep_params
    B = x.shape[0]

    # Batch tile: fill the MXU (256 rows) when the batch allows; shrink for
    # tiny batches (sublane multiple of 8).
    if tile_b is None:
        tile_b = min(DEFAULT_TILE_B, _round_up(B, 8))
    tile_b = _round_up(tile_b, 8)
    B_pad = _round_up(B, tile_b)
    n_tiles = B_pad // tile_b

    # Zero-pad + cast activations once in the wrapper (cheap at these sizes).
    x_pad = jnp.zeros((B_pad, N_PAD), jnp.bfloat16).at[:B, :N_STATES].set(
        x.astype(jnp.bfloat16))

    flops = 2 * B_pad * (N_PAD * H1 + H1 * H2 + H2 * N_PAD)
    bytes_accessed = (
        2 * (N_PAD * H1 + H1 * H2 + H2 * N_PAD)   # bf16 weights (resident)
        + 4 * (H1 + H2 + N_PAD)                   # f32 biases
        + 2 * B_pad * N_PAD                       # bf16 x in
        + 4 * B_pad * N_PAD)                      # f32 out

    # Weights/biases use a constant index_map -> fetched once, stay resident
    # across batch tiles.  Activations/out are tiled over the batch grid axis.
    const = lambda i: (0, 0)
    out_padded = pl.pallas_call(
        mlp_kernel,
        out_shape=jax.ShapeDtypeStruct((B_pad, N_PAD), jnp.float32),
        grid=(n_tiles,),
        in_specs=[
            pl.BlockSpec((tile_b, N_PAD), lambda i: (i, 0)),   # x
            pl.BlockSpec((N_PAD, H1), const),                  # w1
            pl.BlockSpec((1, H1), const),                      # b1
            pl.BlockSpec((H1, H2), const),                     # w2
            pl.BlockSpec((1, H2), const),                      # b2
            pl.BlockSpec((H2, N_PAD), const),                  # w3
            pl.BlockSpec((1, N_PAD), const),                   # b3
        ],
        out_specs=pl.BlockSpec((tile_b, N_PAD), lambda i: (i, 0)),
        compiler_params=pltpu.CompilerParams(
            dimension_semantics=("parallel",)),
        cost_estimate=pl.CostEstimate(flops=flops, transcendentals=0,
                                      bytes_accessed=bytes_accessed),
    )(x_pad, w1, b1, w2, b2, w3, b3)
    return out_padded[:B, :N_ACTIONS]


def init_params(key):
    """Deterministic synthetic init mirroring the PyTorch module:
    weights ~ Normal(0, 0.1); biases use PyTorch Linear's default
    Uniform(-1/sqrt(fan_in), 1/sqrt(fan_in)). Original (unpadded) f32 shapes,
    stored transposed vs PyTorch, i.e. W has shape (in, out) so y = x @ W + b."""
    ks = jax.random.split(key, 6)
    w1 = 0.1 * jax.random.normal(ks[0], (N_STATES, H1), jnp.float32)
    b1 = jax.random.uniform(ks[1], (1, H1), jnp.float32,
                            -1.0 / jnp.sqrt(N_STATES), 1.0 / jnp.sqrt(N_STATES))
    w2 = 0.1 * jax.random.normal(ks[2], (H1, H2), jnp.float32)
    b2 = jax.random.uniform(ks[3], (1, H2), jnp.float32,
                            -1.0 / jnp.sqrt(H1), 1.0 / jnp.sqrt(H1))
    w3 = 0.1 * jax.random.normal(ks[4], (H2, N_ACTIONS), jnp.float32)
    b3 = jax.random.uniform(ks[5], (1, N_ACTIONS), jnp.float32,
                            -1.0 / jnp.sqrt(H2), 1.0 / jnp.sqrt(H2))
    return w1, b1, w2, b2, w3, b3


def prepare_params(params):
    """One-time prep: zero-pad 225-wide dims to 256 and cast weights to bf16."""
    w1, b1, w2, b2, w3, b3 = params
    w1p = jnp.zeros((N_PAD, H1), jnp.bfloat16).at[:N_STATES, :].set(
        w1.astype(jnp.bfloat16))
    w2p = w2.astype(jnp.bfloat16)
    w3p = jnp.zeros((H2, N_PAD), jnp.bfloat16).at[:, :N_ACTIONS].set(
        w3.astype(jnp.bfloat16))
    b3p = jnp.zeros((1, N_PAD), jnp.float32).at[:, :N_ACTIONS].set(b3)
    return w1p, b1, w2p, b2, w3p, b3p


def reference_forward_f32(x, params):
    """Full-precision reference (matches the PyTorch module's math)."""
    w1, b1, w2, b2, w3, b3 = params
    h = jnp.maximum(x @ w1 + b1, 0.0)
    h = jnp.maximum(h @ w2 + b2, 0.0)
    return h @ w3 + b3


def reference_forward_bf16(x, prep_params):
    """Reference with the exact same bf16/pad numerics as the kernel."""
    w1, b1, w2, b2, w3, b3 = prep_params
    B = x.shape[0]
    xb = jnp.zeros((B, N_PAD), jnp.bfloat16).at[:, :N_STATES].set(
        x.astype(jnp.bfloat16))
    h = jnp.maximum(
        jnp.dot(xb, w1, preferred_element_type=jnp.float32) + b1, 0.0)
    h = jnp.maximum(
        jnp.dot(h.astype(jnp.bfloat16), w2,
                preferred_element_type=jnp.float32) + b2, 0.0)
    h = jnp.dot(h.astype(jnp.bfloat16), w3,
                preferred_element_type=jnp.float32) + b3
    return h[:, :N_ACTIONS]


if __name__ == "__main__":
    key = jax.random.PRNGKey(0)
    kx, kp, kx2 = jax.random.split(key, 3)
    params = init_params(kp)
    prep = prepare_params(params)

    # --- Small demo batch (B=2, single grid step) ---
    B = 2
    x = jax.random.normal(kx, (B, N_STATES), jnp.float32)
    out = jax.block_until_ready(net_forward(x, prep))
    assert out.shape == (B, N_ACTIONS)

    # Tight check against a reference using identical bf16/pad numerics.
    ref_bf16 = reference_forward_bf16(x, prep)
    assert jnp.allclose(out, ref_bf16, atol=2e-3, rtol=2e-3)

    # Loose sanity check against the full-f32 PyTorch-equivalent math
    # (bf16 weight storage introduces ~1% relative error).
    ref_f32 = reference_forward_f32(x, params)
    assert jnp.allclose(out, ref_f32, atol=0.2, rtol=0.1)

    # --- Exercise the multi-tile batch grid (grid > 1, ragged last tile) ---
    B2 = 20
    x2 = jax.random.normal(kx2, (B2, N_STATES), jnp.float32)
    out2 = jax.block_until_ready(net_forward(x2, prep, tile_b=8))
    assert out2.shape == (B2, N_ACTIONS)
    assert jnp.allclose(out2, reference_forward_bf16(x2, prep),
                        atol=2e-3, rtol=2e-3)

    print("KERNEL_OK")
</pallas_src>

<mosaic_0001>
module attributes {stable_mosaic.version = 11 : i64} {
  func.func @mlp_kernel(%arg0: i32, %arg1: memref<8x256xbf16, #tpu.memory_space<vmem>>, %arg2: memref<256x1024xbf16, #tpu.memory_space<vmem>>, %arg3: memref<1x1024xf32, #tpu.memory_space<vmem>>, %arg4: memref<1024x512xbf16, #tpu.memory_space<vmem>>, %arg5: memref<1x512xf32, #tpu.memory_space<vmem>>, %arg6: memref<512x256xbf16, #tpu.memory_space<vmem>>, %arg7: memref<1x256xf32, #tpu.memory_space<vmem>>, %arg8: memref<8x256xf32, #tpu.memory_space<vmem>>) attributes {dimension_semantics = [#tpu.dimension_semantics<parallel>], iteration_bounds = array<i64: 1>, scalar_prefetch = 0 : i64, scratch_operands = 0 : i64, tpu.core_type = #tpu.core_type<tc>, window_params = [{transform_indices = @transform_0, window_bounds = array<i64: 8, 256>}, {pipeline_mode = #tpu.pipeline_mode<synchronous>, transform_indices = @transform_1, window_bounds = array<i64: 256, 1024>}, {pipeline_mode = #tpu.pipeline_mode<synchronous>, transform_indices = @transform_2, window_bounds = array<i64: 1, 1024>}, {pipeline_mode = #tpu.pipeline_mode<synchronous>, transform_indices = @transform_3, window_bounds = array<i64: 1024, 512>}, {pipeline_mode = #tpu.pipeline_mode<synchronous>, transform_indices = @transform_4, window_bounds = array<i64: 1, 512>}, {pipeline_mode = #tpu.pipeline_mode<synchronous>, transform_indices = @transform_5, window_bounds = array<i64: 512, 256>}, {pipeline_mode = #tpu.pipeline_mode<synchronous>, transform_indices = @transform_6, window_bounds = array<i64: 1, 256>}, {transform_indices = @transform_7, window_bounds = array<i64: 8, 256>}]} {
    %c0 = arith.constant 0 : index
    %c0_0 = arith.constant 0 : index
    %0 = vector.load %arg1[%c0, %c0_0] : memref<8x256xbf16, #tpu.memory_space<vmem>>, vector<8x256xbf16>
    %c0_1 = arith.constant 0 : index
    %c0_2 = arith.constant 0 : index
    %1 = vector.load %arg2[%c0_1, %c0_2] : memref<256x1024xbf16, #tpu.memory_space<vmem>>, vector<256x1024xbf16>
    %cst = arith.constant dense<0.000000e+00> : vector<8x1024xf32>
    %2 = tpu.matmul %0, %1, %cst {dimension_numbers = #tpu.dot_dimension_numbers<[1], [0], [0], [1], [0, 0, 1, 1], [], []>} : vector<8x256xbf16>, vector<256x1024xbf16>, vector<8x1024xf32> -> vector<8x1024xf32>
    %c0_3 = arith.constant 0 : index
    %c0_4 = arith.constant 0 : index
    %3 = vector.load %arg3[%c0_3, %c0_4] : memref<1x1024xf32, #tpu.memory_space<vmem>>, vector<1x1024xf32>
    %4 = vector.broadcast %3 : vector<1x1024xf32> to vector<8x1024xf32>
    %5 = arith.addf %2, %4 : vector<8x1024xf32>
    %cst_5 = arith.constant 0.000000e+00 : f32
    %6 = vector.broadcast %cst_5 : f32 to vector<8x1024xf32>
    %7 = arith.maximumf %5, %6 : vector<8x1024xf32>
    %8 = arith.truncf %7 : vector<8x1024xf32> to vector<8x1024xbf16>
    %c0_6 = arith.constant 0 : index
    %c0_7 = arith.constant 0 : index
    %9 = vector.load %arg4[%c0_6, %c0_7] : memref<1024x512xbf16, #tpu.memory_space<vmem>>, vector<1024x512xbf16>
    %cst_8 = arith.constant dense<0.000000e+00> : vector<8x512xf32>
    %10 = tpu.matmul %8, %9, %cst_8 {dimension_numbers = #tpu.dot_dimension_numbers<[1], [0], [0], [1], [0, 0, 1, 1], [], []>} : vector<8x1024xbf16>, vector<1024x512xbf16>, vector<8x512xf32> -> vector<8x512xf32>
    %c0_9 = arith.constant 0 : index
    %c0_10 = arith.constant 0 : index
    %11 = vector.load %arg5[%c0_9, %c0_10] : memref<1x512xf32, #tpu.memory_space<vmem>>, vector<1x512xf32>
    %12 = vector.broadcast %11 : vector<1x512xf32> to vector<8x512xf32>
    %13 = arith.addf %10, %12 : vector<8x512xf32>
    %cst_11 = arith.constant 0.000000e+00 : f32
    %14 = vector.broadcast %cst_11 : f32 to vector<8x512xf32>
    %15 = arith.maximumf %13, %14 : vector<8x512xf32>
    %16 = arith.truncf %15 : vector<8x512xf32> to vector<8x512xbf16>
    %c0_12 = arith.constant 0 : index
    %c0_13 = arith.constant 0 : index
    %17 = vector.load %arg6[%c0_12, %c0_13] : memref<512x256xbf16, #tpu.memory_space<vmem>>, vector<512x256xbf16>
    %cst_14 = arith.constant dense<0.000000e+00> : vector<8x256xf32>
    %18 = tpu.matmul %16, %17, %cst_14 {dimension_numbers = #tpu.dot_dimension_numbers<[1], [0], [0], [1], [0, 0, 1, 1], [], []>} : vector<8x512xbf16>, vector<512x256xbf16>, vector<8x256xf32> -> vector<8x256xf32>
    %c0_15 = arith.constant 0 : index
    %c0_16 = arith.constant 0 : index
    %19 = vector.load %arg7[%c0_15, %c0_16] : memref<1x256xf32, #tpu.memory_space<vmem>>, vector<1x256xf32>
    %20 = vector.broadcast %19 : vector<1x256xf32> to vector<8x256xf32>
    %21 = arith.addf %18, %20 : vector<8x256xf32>
    %c0_17 = arith.constant 0 : index
    %c0_18 = arith.constant 0 : index
    %22 = vector.load %arg8[%c0_17, %c0_18] : memref<8x256xf32, #tpu.memory_space<vmem>>, vector<8x256xf32>
    tpu.vector_store %arg8[%c0_17, %c0_18], %21 {strides = array<i32>} : memref<8x256xf32, #tpu.memory_space<vmem>>, vector<8x256xf32>,
    return
  }
  func.func @transform_0(%arg0: i32) -> (i32, i32) {
    %c0_i32 = arith.constant 0 : i32
    %c0_i32_0 = arith.constant 0 : i32
    return %arg0, %c0_i32 : i32, i32
  }
  func.func @transform_1(%arg0: i32) -> (i32, i32) {
    %c0_i32 = arith.constant 0 : i32
    %c0_i32_0 = arith.constant 0 : i32
    %c0_i32_1 = arith.constant 0 : i32
    return %c0_i32, %c0_i32_0 : i32, i32
  }
  func.func @transform_2(%arg0: i32) -> (i32, i32) {
    %c0_i32 = arith.constant 0 : i32
    %c0_i32_0 = arith.constant 0 : i32
    %c0_i32_1 = arith.constant 0 : i32
    return %c0_i32, %c0_i32_0 : i32, i32
  }
  func.func @transform_3(%arg0: i32) -> (i32, i32) {
    %c0_i32 = arith.constant 0 : i32
    %c0_i32_0 = arith.constant 0 : i32
    %c0_i32_1 = arith.constant 0 : i32
    return %c0_i32, %c0_i32_0 : i32, i32
  }
  func.func @transform_4(%arg0: i32) -> (i32, i32) {
    %c0_i32 = arith.constant 0 : i32
    %c0_i32_0 = arith.constant 0 : i32
    %c0_i32_1 = arith.constant 0 : i32
    return %c0_i32, %c0_i32_0 : i32, i32
  }
  func.func @transform_5(%arg0: i32) -> (i32, i32) {
    %c0_i32 = arith.constant 0 : i32
    %c0_i32_0 = arith.constant 0 : i32
    %c0_i32_1 = arith.constant 0 : i32
    return %c0_i32, %c0_i32_0 : i32, i32
  }
  func.func @transform_6(%arg0: i32) -> (i32, i32) {
    %c0_i32 = arith.constant 0 : i32
    %c0_i32_0 = arith.constant 0 : i32
    %c0_i32_1 = arith.constant 0 : i32
    return %c0_i32, %c0_i32_0 : i32, i32
  }
  func.func @transform_7(%arg0: i32) -> (i32, i32) {
    %c0_i32 = arith.constant 0 : i32
    %c0_i32_0 = arith.constant 0 : i32
    return %arg0, %c0_i32 : i32, i32
  }
}

</mosaic_0001>

<bundles_post_ra>
// kernel: tpu_custom_call.1
= control target key start
LH: loop header
LB: loop body
LE: loop exit
PB: predicated region body
PF: predicated region fallthrough
CT: control target
= control target key end

     0   :  { %12 = vsyncpa [#allocation3], 0  ;;  %s4802_s0 = inlined_call_operand.hbm [shape: bf16[8,256], index: 0, kind: input, shape index: {}]   ;;  %s4803_s1 = inlined_call_operand.hbm [shape: bf16[256,1024], index: 1, kind: input, shape index: {}]   ;;  %s4804_s2 = inlined_call_operand.hbm [shape: f32[1,1024], index: 2, kind: input, shape index: {}]   ;;  %s4805_s3 = inlined_call_operand.hbm [shape: bf16[1024,512], index: 3, kind: input, shape index: {}]   ;;  %s4806_s4 = inlined_call_operand.vmem [shape: f32[1,512], index: 4, kind: input, shape index: {}]   ;;  %s4807_s5 = inlined_call_operand.hbm [shape: bf16[512,256], index: 5, kind: input, shape index: {}]   ;;  %s4808_s6 = inlined_call_operand.vmem [shape: f32[1,256], index: 6, kind: input, shape index: {}]   ;;  %s4809_s7 = inlined_call_operand.hbm [shape: f32[8,256], index: 7, kind: output, shape index: {}]  }
   0x1   :  { %13 = vsyncpa [#allocation6], 0 }
   0x2   :  { %14 = vsyncpa [#allocation9], 0 }
   0x3   :  { %15 = vsyncpa [#allocation4], 0  ;;  %s4598_s24 = smov [#allocation5]   ;;  %s4458_s28 = scalar_lea.hbm %s4803_s1, 16384 }
   0x4   :  { %s31_s25 = sshll.u32 %s4598_s24, 4  ;;  %p4459_p0 = scmp.ne.s32.totalorder %s4803_s1, %s4458_s28  ;;  %s32_s25 = int_to_ptr.vmem [resolvable:$true] %s31_s25 }
   0x5   :  { %p4462_p1 = scmp.lt.u32.totalorder %s4458_s28, %s4803_s1 }
   0x7   :  { %p4464_p2 = pnand %p4462_p1, %p4459_p0 }
   0x9   :  { %4467 = shalt.err (!%p4464_p2)
}
   0xa   :  { %s4468_s10 = scalar_lea.vmem %s32_s25, 16384  ;;  %p4473_p4 = scmp.lt.s32.totalorder %s32_s25, %s32_s25 }
   0xb   :  { %p4469_p3 = scmp.ne.s32.totalorder %s32_s25, %s4468_s10  ;;  %p4474_p5 = scmp.lt.s32.totalorder %s4468_s10, %s4468_s10 }
   0xd   :  { %p4475_p6 = por %p4474_p5, %p4473_p4 }
   0xf   :  { %p4476_p7 = pnand %p4475_p6, %p4469_p3 }
  0x11   :  { %4479 = shalt.err (!%p4476_p7)
}
  0x12   :  { %s4599_s11 = smov 512   ;;  %s4600_s12 = smov 32  }
  0x13   :  { %37 = dma.hbm_to_vmem [thread:$0]  %s4803_s1, 16384, %s32_s25, [#allocation6], %s4599_s11, %s4599_s11, %s4600_s12  }
  0x14   :  { %s4601_s15 = smov [#allocation8]   ;;  %s4480_s19 = scalar_lea.hbm %s4805_s3, 32768 }
  0x15   :  { %s53_s16 = sshll.u32 %s4601_s15, 4  ;;  %p4481_p8 = scmp.ne.s32.totalorder %s4805_s3, %s4480_s19  ;;  %s54_s16 = int_to_ptr.vmem [resolvable:$true] %s53_s16 }
  0x16   :  { %p4484_p9 = scmp.lt.u32.totalorder %s4480_s19, %s4805_s3 }
  0x18   :  { %p4486_p10 = pnand %p4484_p9, %p4481_p8 }
  0x1a   :  { %4489 = shalt.err (!%p4486_p10)
}
  0x1b   :  { %s4490_s24 = scalar_lea.vmem %s54_s16, 32768  ;;  %p4495_p12 = scmp.lt.s32.totalorder %s54_s16, %s54_s16 }
  0x1c   :  { %p4491_p11 = scmp.ne.s32.totalorder %s54_s16, %s4490_s24  ;;  %p4496_p13 = scmp.lt.s32.totalorder %s4490_s24, %s4490_s24 }
  0x1e   :  { %p4497_p0 = por %p4496_p13, %p4495_p12 }
  0x20   :  { %p4498_p1 = pnand %p4497_p0, %p4491_p11 }
  0x22   :  { %4501 = shalt.err (!%p4498_p1)
}
  0x23   :  { %s4602_s1 = smov 256   ;;  %s4603_s25 = smov 16  }
  0x24   :  { %59 = dma.hbm_to_vmem [thread:$0]  %s4805_s3, 32768, %s54_s16, [#allocation9], %s4602_s1, %s4602_s1, %s4603_s25  }
  0x25   :  { %s4604_s28 = smov [#allocation2]   ;;  %s4605_s30 = smov [#allocation7]  }
  0x26   :  { %s22_s29 = sshll.u32 %s4604_s28, 4  ;;  %s44_s8 = sshll.u32 %s4605_s30, 4  ;;  %s23_s29 = int_to_ptr.vmem [resolvable:$true] %s22_s29  ;;  %s45_s8 = int_to_ptr.vmem [resolvable:$true] %s44_s8 }
  0x27   :  { %s4502_s11 = scalar_lea.hbm %s4802_s0, 128 }
  0x28   :  { %p4503_p2 = scmp.ne.s32.totalorder %s4802_s0, %s4502_s11  ;;  %p4506_p3 = scmp.lt.u32.totalorder %s4502_s11, %s4802_s0 }
  0x2a   :  { %p4508_p4 = pnand %p4506_p3, %p4503_p2 }
  0x2c   :  { %4511 = shalt.err (!%p4508_p4)
}
  0x2d   :  { %s4512_s3 = scalar_lea.vmem %s23_s29, 128  ;;  %p4517_p6 = scmp.lt.s32.totalorder %s23_s29, %s23_s29 }
  0x2e   :  { %p4513_p5 = scmp.ne.s32.totalorder %s23_s29, %s4512_s3  ;;  %p4518_p7 = scmp.lt.s32.totalorder %s4512_s3, %s4512_s3 }
  0x30   :  { %p4519_p8 = por %p4518_p7, %p4517_p6 }
  0x32   :  { %p4520_p9 = pnand %p4519_p8, %p4513_p5 }
  0x34   :  { %4523 = shalt.err (!%p4520_p9)
}
  0x35   :  { %25 = dma.hbm_to_vmem [thread:$0]  %s4802_s0, 128, %s23_s29, [#allocation3]  }
  0x36   :  { %s4524_s20 = scalar_lea.hbm %s4804_s2, 128 }
  0x37   :  { %p4525_p10 = scmp.ne.s32.totalorder %s4804_s2, %s4524_s20  ;;  %p4528_p11 = scmp.lt.u32.totalorder %s4524_s20, %s4804_s2 }
  0x39   :  { %p4530_p12 = pnand %p4528_p11, %p4525_p10 }
  0x3b   :  { %4533 = shalt.err (!%p4530_p12)
}
  0x3c   :  { %s4534_s1 = scalar_lea.vmem %s45_s8, 128  ;;  %p4539_p0 = scmp.lt.s32.totalorder %s45_s8, %s45_s8 }
  0x3d   :  { %p4535_p13 = scmp.ne.s32.totalorder %s45_s8, %s4534_s1  ;;  %p4540_p1 = scmp.lt.s32.totalorder %s4534_s1, %s4534_s1 }
  0x3f   :  { %p4541_p2 = por %p4540_p1, %p4539_p0 }
  0x41   :  { %p4542_p3 = pnand %p4541_p2, %p4535_p13 }
  0x43   :  { %4545 = shalt.err (!%p4542_p3)
}
  0x44   :  { %47 = dma.hbm_to_vmem [thread:$0]  %s4804_s2, 128, %s45_s8, [#allocation6]  }
  0x45   :  { %s4606_s26 = smov [#allocation10]   ;;  %s4546_s30 = scalar_lea.hbm %s4807_s5, 8192 }
  0x46   :  { %s67_s27 = sshll.u32 %s4606_s26, 4  ;;  %p4547_p4 = scmp.ne.s32.totalorder %s4807_s5, %s4546_s30  ;;  %s68_s27 = int_to_ptr.vmem [resolvable:$true] %s67_s27 }
  0x47   :  { %p4550_p5 = scmp.lt.u32.totalorder %s4546_s30, %s4807_s5 }
  0x49   :  { %p4552_p6 = pnand %p4550_p5, %p4547_p4 }
  0x4b   :  { %4555 = shalt.err (!%p4552_p6)
}
  0x4c   :  { %s4556_s13 = scalar_lea.vmem %s68_s27, 8192  ;;  %p4561_p8 = scmp.lt.s32.totalorder %s68_s27, %s68_s27 }
  0x4d   :  { %p4557_p7 = scmp.ne.s32.totalorder %s68_s27, %s4556_s13  ;;  %p4562_p9 = scmp.lt.s32.totalorder %s4556_s13, %s4556_s13 }
  0x4f   :  { %p4563_p10 = por %p4562_p9, %p4561_p8 }
  0x51   :  { %p4564_p11 = pnand %p4563_p10, %p4557_p7 }
  0x53   :  { %4567 = shalt.err (!%p4564_p11)
}
  0x54   :  { %s4607_s2 = smov 128   ;;  %s4608_s8 = smov 8  }
  0x55   :  { %73 = dma.hbm_to_vmem [thread:$0]  %s4807_s5, 8192, %s68_s27, [#allocation9], %s4607_s2, %s4607_s2, %s4608_s8  }
  0x56   :  { %4590 = dma.done.wait [#allocation3], 128  }
  0x57   :  { %4591 = vsyncadd [#allocation3], 4294967168 }
  0x58   :  { %4592 = dma.done.wait [#allocation6], 16512  }
  0x59   :  { %4593 = vsyncadd [#allocation6], 4294950784 }
  0x5a   :  { %4594 = dma.done.wait [#allocation9], 40960  }
  0x5b   :  { %4595 = vsyncadd [#allocation9], 4294926336  ;;  %v92_v0 = vld [vmem:[#allocation5] sm:$0xff]  ;;  %v4710_v17 = vld [vmem:[#allocation2] sm:$0xff]  ;;  %s4609_s17 = smov [#allocation11]  }
  0x5c   :  { %v96_v1 = vld [vmem:[#allocation5 + $0x20] sm:$0xff]  ;;  %v4714_v18 = vcombine.high %v4710_v17, %v4710_v17  ;;  %v94_v31 = vld [vmem:[#allocation5 + $0x10] sm:$0xff]  ;;  %s3469_s18 = sshll.u32 %s4609_s17, 4  ;;  %s3470_s18 = int_to_ptr.vmem [resolvable:$true] %s3469_s18 }
  0x5d   :  { %v100_v2 = vld [vmem:[#allocation5 + $0x40] sm:$0xff]  ;;  %v3483_v3 = vcombine.high %v92_v0, %v96_v1  ;;  %v3482_v4 = vcombine.low %v92_v0, %v96_v1  ;;  %v98_v32 = vld [vmem:[#allocation5 + $0x30] sm:$0xff]  ;;  %s4568_s19 = scalar_lea.vmem %s3470_s18, 256  ;;  %p4573_p13 = scmp.lt.s32.totalorder %s3470_s18, %s3470_s18 }
  0x5e   :  { %v104_v5 = vld [vmem:[#allocation5 + $0x60] sm:$0xff]  ;;  %941 = vmatprep.mubr.bf16.mxu1 %v4714_v18  ;;  %1023 = vmatprep.mubr.bf16.mxu0 %v4714_v18  ;;  %v102_v33 = vld [vmem:[#allocation5 + $0x50] sm:$0xff]  ;;  %v3487_v35 = vcombine.high %v94_v31, %v98_v32  ;;  %v3486_v36 = vcombine.low %v94_v31, %v98_v32  ;;  %p4569_p12 = scmp.ne.s32.totalorder %s3470_s18, %s4568_s19  ;;  %p4574_p0 = scmp.lt.s32.totalorder %s4568_s19, %s4568_s19 }
  0x5f   :  { %v3491_v6 = vcombine.high %v100_v2, %v104_v5  ;;  %v108_v7 = vld [vmem:[#allocation5 + $0x80] sm:$0xff]  ;;  %909 = vmatprep.subr.bf16.mxu1 %v3483_v3  ;;  %v3490_v9 = vcombine.low %v100_v2, %v104_v5  ;;  %v106_v34 = vld [vmem:[#allocation5 + $0x70] sm:$0xff] }
  0x60   :  { %v112_v8 = vld [vmem:[#allocation5 + $0xa0] sm:$0xff]  ;;  %910 = vmatpush1.bf16.msra.mxu1 %v3482_v4  ;;  %v3495_v37 = vcombine.high %v102_v33, %v106_v34  ;;  %v110_v39 = vld [vmem:[#allocation5 + $0x90] sm:$0xff]  ;;  %991 = vmatprep.subr.bf16.mxu0 %v3487_v35  ;;  %v3494_v44 = vcombine.low %v102_v33, %v106_v34  ;;  %p4575_p1 = por %p4574_p0, %p4573_p13 }
  0x61   :  { %911 = vmatprep.subr.bf16.mxu1 %v3491_v6  ;;  %v3499_v10 = vcombine.high %v108_v7, %v112_v8  ;;  %v116_v11 = vld [vmem:[#allocation5 + $0xc0] sm:$0xff]  ;;  %v3498_v13 = vcombine.low %v108_v7, %v112_v8  ;;  %v114_v40 = vld [vmem:[#allocation5 + $0xb0] sm:$0xff]  ;;  %992 = vmatpush1.bf16.msra.mxu0 %v3486_v36 }
  0x62   :  { %v120_v12 = vld [vmem:[#allocation5 + $0xe0] sm:$0xff]  ;;  %993 = vmatprep.subr.bf16.mxu0 %v3495_v37  ;;  %v3503_v45 = vcombine.high %v110_v39, %v114_v40  ;;  %v118_v47 = vld [vmem:[#allocation5 + $0xd0] sm:$0xff]  ;;  %v3502_v52 = vcombine.low %v110_v39, %v114_v40  ;;  %p4576_p2 = pnand %p4575_p1, %p4569_p12 }
  0x63   :  { %v3507_v14 = vcombine.high %v116_v11, %v120_v12  ;;  %v124_v15 = vld [vmem:[#allocation5 + $0x100] sm:$0xff]  ;;  %v3506_v19 = vcombine.low %v116_v11, %v120_v12  ;;  %v122_v48 = vld [vmem:[#allocation5 + $0xf0] sm:$0xff] }
  0x64   :  { %912 = vmatpush1.bf16.msra.mxu1 %v3490_v9  ;;  %v128_v16 = vld [vmem:[#allocation5 + $0x120] sm:$0xff]  ;;  %v3511_v53 = vcombine.high %v118_v47, %v122_v48  ;;  %v126_v55 = vld [vmem:[#allocation5 + $0x110] sm:$0xff]  ;;  %v3510_v60 = vcombine.low %v118_v47, %v122_v48 }
  0x65   :  { %913 = vmatprep.subr.bf16.mxu1 %v3499_v10  ;;  %v3515_v20 = vcombine.high %v124_v15, %v128_v16  ;;  %v132_v21 = vld [vmem:[#allocation5 + $0x140] sm:$0xff]  ;;  %v3514_v23 = vcombine.low %v124_v15, %v128_v16  ;;  %994 = vmatpush1.bf16.msra.mxu0 %v3494_v44  ;;  %v130_v56 = vld [vmem:[#allocation5 + $0x130] sm:$0xff] }
  0x66   :  { %v136_v22 = vld [vmem:[#allocation5 + $0x160] sm:$0xff]  ;;  %995 = vmatprep.subr.bf16.mxu0 %v3503_v45  ;;  %v3519_v61 = vcombine.high %v126_v55, %v130_v56  ;;  %v134_v63 = vld [vmem:[#allocation5 + $0x150] sm:$0xff]  ;;  %v3518_v4 = vcombine.low %v126_v55, %v130_v56  ;;  %v4720_v55 = vcombine.low %v4710_v17, %v4710_v17  ;;  %v117_v17 = vld [vmem:[#allocation5 + $0xc8] sm:$0xff] }
  0x67   :  { %v3523_v24 = vcombine.high %v132_v21, %v136_v22  ;;  %v140_v25 = vld [vmem:[#allocation5 + $0x180] sm:$0xff]  ;;  %v3522_v27 = vcombine.low %v132_v21, %v136_v22  ;;  %v138_v0 = vld [vmem:[#allocation5 + $0x170] sm:$0xff] }
  0x68   :  { %914 = vmatpush1.bf16.msra.mxu1 %v3498_v13  ;;  %v144_v26 = vld [vmem:[#allocation5 + $0x1a0] sm:$0xff]  ;;  %v3527_v5 = vcombine.high %v134_v63, %v138_v0  ;;  %v142_v9 = vld [vmem:[#allocation5 + $0x190] sm:$0xff]  ;;  %v3526_v12 = vcombine.low %v134_v63, %v138_v0 }
  0x69   :  { %915 = vmatprep.subr.bf16.mxu1 %v3507_v14  ;;  %v3531_v28 = vcombine.high %v140_v25, %v144_v26  ;;  %v148_v29 = vld [vmem:[#allocation5 + $0x1c0] sm:$0xff]  ;;  %v3530_v38 = vcombine.low %v140_v25, %v144_v26  ;;  %996 = vmatpush1.bf16.msra.mxu0 %v3502_v52  ;;  %v146_v10 = vld [vmem:[#allocation5 + $0x1b0] sm:$0xff] }
  0x6a   :  { %v152_v30 = vld [vmem:[#allocation5 + $0x1e0] sm:$0xff]  ;;  %997 = vmatprep.subr.bf16.mxu0 %v3511_v53  ;;  %v3535_v13 = vcombine.high %v142_v9, %v146_v10  ;;  %v3534_v22 = vcombine.low %v142_v9, %v146_v10  ;;  %v166_v35 = vld [vmem:[#allocation5 + $0x250] sm:$0xff]  ;;  %v125_v9 = vld [vmem:[#allocation5 + $0x108] sm:$0xff] }
  0x6b   :  { %v3539_v41 = vcombine.high %v148_v29, %v152_v30  ;;  %v156_v42 = vld [vmem:[#allocation5 + $0x200] sm:$0xff]  ;;  %v3538_v46 = vcombine.low %v148_v29, %v152_v30  ;;  %v170_v36 = vld [vmem:[#allocation5 + $0x270] sm:$0xff] }
  0x6c   :  { %916 = vmatpush1.bf16.msra.mxu1 %v3506_v19  ;;  %v160_v43 = vld [vmem:[#allocation5 + $0x220] sm:$0xff]  ;;  %v150_v19 = vld [vmem:[#allocation5 + $0x1d0] sm:$0xff]  ;;  %v3559_v39 = vcombine.high %v166_v35, %v170_v36 }
  0x6d   :  { %917 = vmatprep.subr.bf16.mxu1 %v3515_v20  ;;  %v3547_v49 = vcombine.high %v156_v42, %v160_v43  ;;  %v164_v50 = vld [vmem:[#allocation5 + $0x240] sm:$0xff]  ;;  %v3546_v54 = vcombine.low %v156_v42, %v160_v43  ;;  %998 = vmatpush1.bf16.msra.mxu0 %v3510_v60  ;;  %v154_v20 = vld [vmem:[#allocation5 + $0x1f0] sm:$0xff]  ;;  %v97_v42 = vld [vmem:[#allocation5 + $0x28] sm:$0xff] }
  0x6e   :  { %v168_v51 = vld [vmem:[#allocation5 + $0x260] sm:$0xff]  ;;  %999 = vmatprep.subr.bf16.mxu0 %v3519_v61  ;;  %v3542_v30 = vcombine.low %v150_v19, %v154_v20  ;;  %v174_v43 = vld [vmem:[#allocation5 + $0x290] sm:$0xff] }
  0x6f   :  { %v3555_v57 = vcombine.high %v164_v50, %v168_v51  ;;  %v172_v58 = vld [vmem:[#allocation5 + $0x280] sm:$0xff]  ;;  %v3554_v62 = vcombine.low %v164_v50, %v168_v51  ;;  %v178_v44 = vld [vmem:[#allocation5 + $0x2b0] sm:$0xff]  ;;  %v105_v50 = vld [vmem:[#allocation5 + $0x68] sm:$0xff] }
  0x70   :  { %918 = vmatpush1.bf16.msra.mxu1 %v3514_v23  ;;  %v176_v59 = vld [vmem:[#allocation5 + $0x2a0] sm:$0xff]  ;;  %v3543_v23 = vcombine.high %v150_v19, %v154_v20  ;;  %v3567_v47 = vcombine.high %v174_v43, %v178_v44  ;;  %v182_v51 = vld [vmem:[#allocation5 + $0x2d0] sm:$0xff]  ;;  %v133_v19 = vld [vmem:[#allocation5 + $0x148] sm:$0xff] }
  0x71   :  { %919 = vmatprep.subr.bf16.mxu1 %v3523_v24  ;;  %v3563_v1 = vcombine.high %v172_v58, %v176_v59  ;;  %v180_v2 = vld [vmem:[#allocation5 + $0x2c0] sm:$0xff]  ;;  %v3562_v6 = vcombine.low %v172_v58, %v176_v59  ;;  %1000 = vmatpush1.bf16.msra.mxu0 %v3518_v4  ;;  %v186_v52 = vld [vmem:[#allocation5 + $0x2f0] sm:$0xff]  ;;  %v109_v58 = vld [vmem:[#allocation5 + $0x88] sm:$0xff] }
  0x72   :  { %v184_v3 = vld [vmem:[#allocation5 + $0x2e0] sm:$0xff]  ;;  %1001 = vmatprep.subr.bf16.mxu0 %v3527_v5  ;;  %v3575_v56 = vcombine.high %v182_v51, %v186_v52  ;;  %v190_v59 = vld [vmem:[#allocation5 + $0x310] sm:$0xff]  ;;  %v3574_v63 = vcombine.low %v182_v51, %v186_v52  ;;  %v121_v5 = vld [vmem:[#allocation5 + $0xe8] sm:$0xff] }
  0x73   :  { %v188_v7 = vld [vmem:[#allocation5 + $0x300] sm:$0xff]  ;;  %v3571_v11 = vcombine.high %v180_v2, %v184_v3  ;;  %v3570_v14 = vcombine.low %v180_v2, %v184_v3  ;;  %v194_v60 = vld [vmem:[#allocation5 + $0x330] sm:$0xff]  ;;  %v173_v51 = vld [vmem:[#allocation5 + $0x288] sm:$0xff] }
  0x74   :  { %920 = vmatpush1.bf16.msra.mxu1 %v3522_v27  ;;  %v192_v8 = vld [vmem:[#allocation5 + $0x320] sm:$0xff]  ;;  %v158_v27 = vld [vmem:[#allocation5 + $0x210] sm:$0xff]  ;;  %v3583_v0 = vcombine.high %v190_v59, %v194_v60  ;;  %v177_v52 = vld [vmem:[#allocation5 + $0x2a8] sm:$0xff] }
  0x75   :  { %921 = vmatprep.subr.bf16.mxu1 %v3531_v28  ;;  %v196_v15 = vld [vmem:[#allocation5 + $0x340] sm:$0xff]  ;;  %v3579_v21 = vcombine.high %v188_v7, %v192_v8  ;;  %1002 = vmatpush1.bf16.msra.mxu0 %v3526_v12  ;;  %v3578_v24 = vcombine.low %v188_v7, %v192_v8  ;;  %v162_v28 = vld [vmem:[#allocation5 + $0x230] sm:$0xff]  ;;  %v3509_v12 = vcombine.high %v117_v17, %v121_v5 }
  0x76   :  { %v200_v16 = vld [vmem:[#allocation5 + $0x360] sm:$0xff]  ;;  %1003 = vmatprep.subr.bf16.mxu0 %v3535_v13  ;;  %v3551_v31 = vcombine.high %v158_v27, %v162_v28  ;;  %v198_v2 = vld [vmem:[#allocation5 + $0x350] sm:$0xff]  ;;  %v129_v13 = vld [vmem:[#allocation5 + $0x128] sm:$0xff] }
  0x77   :  { %v204_v25 = vld [vmem:[#allocation5 + $0x380] sm:$0xff]  ;;  %v3587_v29 = vcombine.high %v196_v15, %v200_v16  ;;  %v3586_v32 = vcombine.low %v196_v15, %v200_v16  ;;  %v202_v3 = vld [vmem:[#allocation5 + $0x370] sm:$0xff]  ;;  %v3508_v16 = vcombine.low %v117_v17, %v121_v5  ;;  %v4008_v17 = vld [vmem:[#allocation8 + $0xa0] ss:$16 sps:$4 sm:$0xff]  }
  0x78   :  { %922 = vmatpush1.bf16.msra.mxu1 %v3530_v38  ;;  %v208_v26 = vld [vmem:[#allocation5 + $0x3a0] sm:$0xff]  ;;  %v3550_v38 = vcombine.low %v158_v27, %v162_v28  ;;  %v3591_v7 = vcombine.high %v198_v2, %v202_v3  ;;  %v206_v10 = vld [vmem:[#allocation5 + $0x390] sm:$0xff]  ;;  %v141_v27 = vld [vmem:[#allocation5 + $0x188] sm:$0xff] }
  0x79   :  { %923 = vmatprep.subr.bf16.mxu1 %v3539_v41  ;;  %1004 = vmatpush1.bf16.msra.mxu0 %v3534_v22  ;;  %v212_v33 = vld [vmem:[#allocation5 + $0x3c0] sm:$0xff]  ;;  %v3595_v37 = vcombine.high %v204_v25, %v208_v26  ;;  %v3594_v40 = vcombine.low %v204_v25, %v208_v26  ;;  %v93_v41 = vld [vmem:[#allocation5 + $0x8] sm:$0xff]  ;;  %v214_v20 = vld [vmem:[#allocation5 + $0x3d0] sm:$0xff]  ;;  %v3517_v22 = vcombine.high %v125_v9, %v129_v13 }
  0x7a   :  { %1005 = vmatprep.subr.bf16.mxu0 %v3543_v23  ;;  %v216_v34 = vld [vmem:[#allocation5 + $0x3e0] sm:$0xff]  ;;  %v3485_v53 = vcombine.high %v93_v41, %v97_v42  ;;  %v137_v23 = vld [vmem:[#allocation5 + $0x168] sm:$0xff]  ;;  %v3516_v26 = vcombine.low %v125_v9, %v129_v13 }
  0x7b   :  { %v3603_v45 = vcombine.high %v212_v33, %v216_v34  ;;  %v3602_v48 = vcombine.low %v212_v33, %v216_v34  ;;  %v145_v28 = vld [vmem:[#allocation5 + $0x1a8] sm:$0xff] }
  0x7c   :  { %924 = vmatpush1.bf16.msra.mxu1 %v3538_v46  ;;  %v3558_v46 = vcombine.low %v166_v35, %v170_v36  ;;  %v149_v33 = vld [vmem:[#allocation5 + $0x1c8] sm:$0xff]  ;;  %v3533_v36 = vcombine.high %v141_v27, %v145_v28 }
  0x7d   :  { %925 = vmatprep.subr.bf16.mxu1 %v3547_v49  ;;  %1006 = vmatpush1.bf16.msra.mxu0 %v3542_v30  ;;  %v101_v49 = vld [vmem:[#allocation5 + $0x48] sm:$0xff] }
  0x7e   :  { %1007 = vmatprep.subr.bf16.mxu0 %v3551_v31  ;;  %v3493_v61 = vcombine.high %v101_v49, %v105_v50  ;;  %v3980_v30 = vld [vmem:[#allocation8 + $0x4] ss:$16 sps:$4 sm:$0xff]   ;;  %v3978_v35 = vld [vmem:[#allocation8] ss:$16 sps:$4 sm:$0xff]  }
  0x7f   :  { %v153_v34 = vld [vmem:[#allocation5 + $0x1e8] sm:$0xff] }
  0x80   :  { %926 = vmatpush1.bf16.msra.mxu1 %v3546_v54  ;;  %v3566_v54 = vcombine.low %v174_v43, %v178_v44  ;;  %v3992_v43 = vld [vmem:[#allocation8 + $0x44] ss:$16 sps:$4 sm:$0xff]   ;;  %v3540_v44 = vcombine.low %v149_v33, %v153_v34  ;;  %v4020_v13 = vld [vmem:[#allocation8 + $0xe0] ss:$16 sps:$4 sm:$0xff]  }
  0x81   :  { %927 = vmatprep.subr.bf16.mxu1 %v3555_v57  ;;  %1008 = vmatpush1.bf16.msra.mxu0 %v3550_v38  ;;  %v3484_v57 = vcombine.low %v93_v41, %v97_v42  ;;  %v3532_v38 = vcombine.low %v141_v27, %v145_v28  ;;  %v3984_v41 = vld [vmem:[#allocation8 + $0x20] ss:$16 sps:$4 sm:$0xff]   ;;  %v3541_v42 = vcombine.high %v149_v33, %v153_v34  ;;  %v4022_v9 = vld [vmem:[#allocation8 + $0xe4] ss:$16 sps:$4 sm:$0xff]  }
  0x82   :  { %1009 = vmatprep.subr.bf16.mxu0 %v3559_v39  ;;  %v157_v39 = vld [vmem:[#allocation5 + $0x208] sm:$0xff] }
  0x83   :  { %v197_v5 = vld [vmem:[#allocation5 + $0x348] sm:$0xff] }
  0x84   :  { %928 = vmatpush1.bf16.msra.mxu1 %v3554_v62  ;;  %v113_v62 = vld [vmem:[#allocation5 + $0xa8] sm:$0xff] }
  0x85   :  { %929 = vmatprep.subr.bf16.mxu1 %v3563_v1  ;;  %1010 = vmatpush1.bf16.msra.mxu0 %v3558_v46  ;;  %v3492_v1 = vcombine.low %v101_v49, %v105_v50  ;;  %v3501_v4 = vcombine.high %v109_v58, %v113_v62  ;;  %v3500_v8 = vcombine.low %v109_v58, %v113_v62  ;;  %v169_v46 = vld [vmem:[#allocation5 + $0x268] sm:$0xff] }
  0x86   :  { %1011 = vmatprep.subr.bf16.mxu0 %v3567_v47  ;;  %v3990_v47 = vld [vmem:[#allocation8 + $0x40] ss:$16 sps:$4 sm:$0xff]   ;;  %v3998_v49 = vld [vmem:[#allocation8 + $0x64] ss:$16 sps:$4 sm:$0xff]  }
  0x87   :  { %v181_v58 = vld [vmem:[#allocation5 + $0x2c8] sm:$0xff] }
  0x88   :  { %930 = vmatpush1.bf16.msra.mxu1 %v3562_v6  ;;  %v3582_v6 = vcombine.low %v190_v59, %v194_v60  ;;  %v185_v59 = vld [vmem:[#allocation5 + $0x2e8] sm:$0xff] }
  0x89   :  { %931 = vmatprep.subr.bf16.mxu1 %v3571_v11  ;;  %1012 = vmatpush1.bf16.msra.mxu0 %v3566_v54  ;;  %v210_v11 = vld [vmem:[#allocation5 + $0x3b0] sm:$0xff]  ;;  %v4002_v60 = vld [vmem:[#allocation8 + $0x80] ss:$16 sps:$4 sm:$0xff]   ;;  %v4010_v62 = vld [vmem:[#allocation8 + $0xa4] ss:$16 sps:$4 sm:$0xff]  }
  0x8a   :  { %1013 = vmatprep.subr.bf16.mxu0 %v3575_v56  ;;  %v3599_v15 = vcombine.high %v206_v10, %v210_v11  ;;  %v4004_v56 = vld [vmem:[#allocation8 + $0x84] ss:$16 sps:$4 sm:$0xff]   ;;  %v4032_v27 = vld [vmem:[#allocation8 + $0x120] ss:$16 sps:$4 sm:$0xff]  }
  0x8b   :  { %v4038_v33 = vld [vmem:[#allocation8 + $0x140] ss:$16 sps:$4 sm:$0xff]  }
  0x8c   :  { %932 = vmatpush1.bf16.msra.mxu1 %v3570_v14  ;;  %v3590_v14 = vcombine.low %v198_v2, %v202_v3  ;;  %v3573_v2 = vcombine.high %v181_v58, %v185_v59  ;;  %v4016_v3 = vld [vmem:[#allocation8 + $0xc4] ss:$16 sps:$4 sm:$0xff]  }
  0x8d   :  { %933 = vmatprep.subr.bf16.mxu1 %v3579_v21  ;;  %1014 = vmatpush1.bf16.msra.mxu0 %v3574_v63  ;;  %v218_v21 = vld [vmem:[#allocation5 + $0x3f0] sm:$0xff]  ;;  %v3564_v63 = vcombine.low %v173_v51, %v177_v52 }
  0x8e   :  { %1015 = vmatprep.subr.bf16.mxu0 %v3583_v0  ;;  %v3607_v25 = vcombine.high %v214_v20, %v218_v21  ;;  %v3606_v31 = vcombine.low %v214_v20, %v218_v21  ;;  %v189_v0 = vld [vmem:[#allocation5 + $0x308] sm:$0xff] }
  0x8f   :  { %v217_v20 = vld [vmem:[#allocation5 + $0x3e8] sm:$0xff] }
  0x90   :  { %934 = vmatpush1.bf16.msra.mxu1 %v3578_v24  ;;  %v3598_v24 = vcombine.low %v206_v10, %v210_v11  ;;  %v205_v11 = vld [vmem:[#allocation5 + $0x388] sm:$0xff] }
  0x91   :  { %935 = vmatprep.subr.bf16.mxu1 %v3587_v29  ;;  %1016 = vmatpush1.bf16.msra.mxu0 %v3582_v6  ;;  %v3525_v29 = vcombine.high %v133_v19, %v137_v23  ;;  %v201_v6 = vld [vmem:[#allocation5 + $0x368] sm:$0xff] }
  0x92   :  { %1017 = vmatprep.subr.bf16.mxu0 %v3591_v7  ;;  %v4014_v7 = vld [vmem:[#allocation8 + $0xc0] ss:$16 sps:$4 sm:$0xff]  }
  0x93   :  { %v4026_v21 = vld [vmem:[#allocation8 + $0x100] ss:$16 sps:$4 sm:$0xff]  }
  0x94   :  { %936 = vmatpush1.bf16.msra.mxu1 %v3586_v32  ;;  %v3524_v32 = vcombine.low %v133_v19, %v137_v23  ;;  %v213_v19 = vld [vmem:[#allocation5 + $0x3c8] sm:$0xff] }
  0x95   :  { %937 = vmatprep.subr.bf16.mxu1 %v3595_v37  ;;  %1018 = vmatpush1.bf16.msra.mxu0 %v3590_v14  ;;  %v3986_v37 = vld [vmem:[#allocation8 + $0x24] ss:$16 sps:$4 sm:$0xff]   ;;  %v3589_v14 = vcombine.high %v197_v5, %v201_v6  ;;  %v3605_v28 = vcombine.high %v213_v19, %v217_v20 }
  0x96   :  { %1019 = vmatprep.subr.bf16.mxu0 %v3599_v15  ;;  %v4028_v15 = vld [vmem:[#allocation8 + $0x104] ss:$16 sps:$4 sm:$0xff]  }
  0x97   :  { %v4034_v23 = vld [vmem:[#allocation8 + $0x124] ss:$16 sps:$4 sm:$0xff]  }
  0x98   :  { %938 = vmatpush1.bf16.msra.mxu1 %v3594_v40  ;;  %v161_v40 = vld [vmem:[#allocation5 + $0x228] sm:$0xff] }
  0x99   :  { %939 = vmatprep.subr.bf16.mxu1 %v3603_v45  ;;  %1020 = vmatpush1.bf16.msra.mxu0 %v3598_v24  ;;  %v165_v45 = vld [vmem:[#allocation5 + $0x248] sm:$0xff]  ;;  %v3548_v50 = vcombine.low %v157_v39, %v161_v40 }
  0x9a   :  { %1021 = vmatprep.subr.bf16.mxu0 %v3607_v25  ;;  %v3557_v54 = vcombine.high %v165_v45, %v169_v46  ;;  %v95_v25 = vld [vmem:[#allocation5 + $0x18] sm:$0xff] }
  0x9c   :  { %940 = vmatpush1.bf16.msra.mxu1 %v3602_v48  ;;  %v3549_v48 = vcombine.high %v157_v39, %v161_v40  ;;  %v4044_v39 = vld [vmem:[#allocation8 + $0x160] ss:$16 sps:$4 sm:$0xff]  }
  0x9d   :  { %950 = vmatprep.subr.bf16.mxu1 %v3485_v53  ;;  %1022 = vmatpush1.bf16.msra.mxu0 %v3606_v31  ;;  %v3996_v53 = vld [vmem:[#allocation8 + $0x60] ss:$16 sps:$4 sm:$0xff]  }
  0x9e   :  { %2647 = vmatprep.subr.bf16.mxu0 %v3980_v30  ;;  %v3604_v30 = vcombine.low %v213_v19, %v217_v20  ;;  %v103_v31 = vld [vmem:[#allocation5 + $0x58] sm:$0xff] }
  0x9f   :  { %942 = vmatmul.mubr.bf16.vlgmr.msra.gmra.mrb[0].mxu1 %v4720_v55 }
  0xa0   :  { %951 = vmatpush1.bf16.msra.mxu1 %v3484_v57  ;;  %982 = vmatprep.mubr.bf16.mxu1 %v4714_v18  ;;  %v3556_v57 = vcombine.low %v165_v45, %v169_v46  ;;  %v4050_v45 = vld [vmem:[#allocation8 + $0x180] ss:$16 sps:$4 sm:$0xff]  }
  0xa1   :  { %952 = vmatprep.subr.bf16.mxu1 %v3493_v61  ;;  %1024 = vmatmul.mubr.bf16.vlgmr.msra.gmra.mrb[0].mxu0 %v4720_v55  ;;  %v3565_v61 = vcombine.high %v173_v51, %v177_v52  ;;  %v4056_v51 = vld [vmem:[#allocation8 + $0x1a0] ss:$16 sps:$4 sm:$0xff]  }
  0xa2   :  { %2648 = vmatpush1.bf16.msra.mxu0 %v3978_v35  ;;  %v4046_v35 = vld [vmem:[#allocation8 + $0x164] ss:$16 sps:$4 sm:$0xff]  }
  0xa3   :  { %2649 = vmatprep.subr.bf16.mxu0 %v3986_v37  ;;  %v111_v37 = vld [vmem:[#allocation5 + $0x98] sm:$0xff] }
  0xa4   :  { %953 = vmatpush1.bf16.msra.mxu1 %v3492_v1  ;;  %v193_v1 = vld [vmem:[#allocation5 + $0x328] sm:$0xff] }
  0xa5   :  { %954 = vmatprep.subr.bf16.mxu1 %v3501_v4  ;;  %v3572_v4 = vcombine.low %v181_v58, %v185_v59  ;;  %v3580_v10 = vcombine.low %v189_v0, %v193_v1  ;;  %v143_v58 = vld [vmem:[#allocation5 + $0x198] sm:$0xff] }
  0xa6   :  { %2650 = vmatpush1.bf16.msra.mxu0 %v3984_v41  ;;  %v4052_v41 = vld [vmem:[#allocation8 + $0x184] ss:$16 sps:$4 sm:$0xff]  }
  0xa7   :  { %2651 = vmatprep.subr.bf16.mxu0 %v3992_v43  ;;  %v119_v43 = vld [vmem:[#allocation5 + $0xd8] sm:$0xff] }
  0xa8   :  { %955 = vmatpush1.bf16.msra.mxu1 %v3500_v8  ;;  %v3581_v8 = vcombine.high %v189_v0, %v193_v1  ;;  %v147_v59 = vld [vmem:[#allocation5 + $0x1b8] sm:$0xff] }
  0xa9   :  { %956 = vmatprep.subr.bf16.mxu1 %v3509_v12  ;;  %v209_v12 = vld [vmem:[#allocation5 + $0x3a8] sm:$0xff]  ;;  %v3537_v0 = vcombine.high %v143_v58, %v147_v59  ;;  %v155_v1 = vld [vmem:[#allocation5 + $0x1f8] sm:$0xff] }
  0xaa   :  { %2652 = vmatpush1.bf16.msra.mxu0 %v3990_v47  ;;  %v3596_v24 = vcombine.low %v205_v11, %v209_v12  ;;  %v4058_v47 = vld [vmem:[#allocation8 + $0x1a4] ss:$16 sps:$4 sm:$0xff]  }
  0xab   :  { %2653 = vmatprep.subr.bf16.mxu0 %v3998_v49  ;;  %v127_v49 = vld [vmem:[#allocation5 + $0x118] sm:$0xff] }
  0xac   :  { %957 = vmatpush1.bf16.msra.mxu1 %v3508_v16  ;;  %v3588_v16 = vcombine.low %v197_v5, %v201_v6  ;;  %v163_v6 = vld [vmem:[#allocation5 + $0x238] sm:$0xff] }
  0xad   :  { %958 = vmatprep.subr.bf16.mxu1 %v3517_v22  ;;  %v3597_v22 = vcombine.high %v205_v11, %v209_v12  ;;  %v167_v11 = vld [vmem:[#allocation5 + $0x258] sm:$0xff] }
  0xae   :  { %2654 = vmatpush1.bf16.msra.mxu0 %v3996_v53  ;;  %v171_v12 = vld [vmem:[#allocation5 + $0x278] sm:$0xff] }
  0xaf   :  { %2655 = vmatprep.subr.bf16.mxu0 %v4004_v56  ;;  %v139_v56 = vld [vmem:[#allocation5 + $0x178] sm:$0xff]  ;;  %v3560_v19 = vcombine.low %v167_v11, %v171_v12 }
  0xb0   :  { %959 = vmatpush1.bf16.msra.mxu1 %v3516_v26  ;;  %v99_v26 = vld [vmem:[#allocation5 + $0x38] sm:$0xff] }
  0xb1   :  { %960 = vmatprep.subr.bf16.mxu1 %v3525_v29  ;;  %v4040_v29 = vld [vmem:[#allocation8 + $0x144] ss:$16 sps:$4 sm:$0xff]   ;;  %v3489_v34 = vcombine.high %v95_v25, %v99_v26 }
  0xb2   :  { %2656 = vmatpush1.bf16.msra.mxu0 %v4002_v60 }
  0xb3   :  { %2657 = vmatprep.subr.bf16.mxu0 %v4010_v62  ;;  %v151_v62 = vld [vmem:[#allocation5 + $0x1d8] sm:$0xff] }
  0xb4   :  { %961 = vmatpush1.bf16.msra.mxu1 %v3524_v32  ;;  %v107_v32 = vld [vmem:[#allocation5 + $0x78] sm:$0xff]  ;;  %v3545_v5 = vcombine.high %v151_v62, %v155_v1 }
  0xb5   :  { %962 = vmatprep.subr.bf16.mxu1 %v3533_v36  ;;  %v3488_v36 = vcombine.low %v95_v25, %v99_v26  ;;  %v3497_v40 = vcombine.high %v103_v31, %v107_v32  ;;  %v191_v25 = vld [vmem:[#allocation5 + $0x318] sm:$0xff] }
  0xb6   :  { %2658 = vmatpush1.bf16.msra.mxu0 %v4008_v17  ;;  %v4062_v17 = vld [vmem:[#allocation8 + $0x1c0] ss:$16 sps:$4 sm:$0xff]  }
  0xb7   :  { %2659 = vmatprep.subr.bf16.mxu0 %v4016_v3  ;;  %v159_v3 = vld [vmem:[#allocation5 + $0x218] sm:$0xff] }
  0xb8   :  { %963 = vmatpush1.bf16.msra.mxu1 %v3532_v38  ;;  %v115_v38 = vld [vmem:[#allocation5 + $0xb8] sm:$0xff] }
  0xb9   :  { %964 = vmatprep.subr.bf16.mxu1 %v3541_v42  ;;  %v3496_v42 = vcombine.low %v103_v31, %v107_v32  ;;  %v3505_v46 = vcombine.high %v111_v37, %v115_v38  ;;  %v195_v26 = vld [vmem:[#allocation5 + $0x338] sm:$0xff] }
  0xba   :  { %2660 = vmatpush1.bf16.msra.mxu0 %v4014_v7  ;;  %v4068_v7 = vld [vmem:[#allocation8 + $0x1e0] ss:$16 sps:$4 sm:$0xff]   ;;  %v3584_v31 = vcombine.low %v191_v25, %v195_v26 }
  0xbb   :  { %2661 = vmatprep.subr.bf16.mxu0 %v4022_v9  ;;  %v4076_v9 = vld [vmem:[#allocation8 + $0x204] ss:$16 sps:$4 sm:$0xff]  }
  0xbc   :  { %965 = vmatpush1.bf16.msra.mxu1 %v3540_v44  ;;  %v123_v44 = vld [vmem:[#allocation5 + $0xf8] sm:$0xff] }
  0xbd   :  { %966 = vmatprep.subr.bf16.mxu1 %v3549_v48  ;;  %v3504_v48 = vcombine.low %v111_v37, %v115_v38  ;;  %v3513_v52 = vcombine.high %v119_v43, %v123_v44  ;;  %v3512_v53 = vcombine.low %v119_v43, %v123_v44  ;;  %v215_v37 = vld [vmem:[#allocation5 + $0x3d8] sm:$0xff]  ;;  %v3981_v43 = vld [vmem:[#allocation8 + $0x8] ss:$16 sps:$4 sm:$0xff]   ;;  %v3989_v44 = vld [vmem:[#allocation8 + $0x2c] ss:$16 sps:$4 sm:$0xff]  }
  0xbe   :  { %2662 = vmatpush1.bf16.msra.mxu0 %v4020_v13  ;;  %v3552_v13 = vcombine.low %v159_v3, %v163_v6  ;;  %v219_v38 = vld [vmem:[#allocation5 + $0x3f8] sm:$0xff] }
  0xbf   :  { %2663 = vmatprep.subr.bf16.mxu0 %v4028_v15  ;;  %v175_v15 = vld [vmem:[#allocation5 + $0x298] sm:$0xff] }
  0xc0   :  { %967 = vmatpush1.bf16.msra.mxu1 %v3548_v50  ;;  %v131_v50 = vld [vmem:[#allocation5 + $0x138] sm:$0xff] }
  0xc1   :  { %968 = vmatprep.subr.bf16.mxu1 %v3557_v54  ;;  %v135_v54 = vld [vmem:[#allocation5 + $0x158] sm:$0xff] }
  0xc2   :  { %2664 = vmatpush1.bf16.msra.mxu0 %v4026_v21  ;;  %v3529_v60 = vcombine.high %v135_v54, %v139_v56  ;;  %v183_v21 = vld [vmem:[#allocation5 + $0x2d8] sm:$0xff] }
  0xc3   :  { %2665 = vmatprep.subr.bf16.mxu0 %v4034_v23 }
  0xc4   :  { %969 = vmatpush1.bf16.msra.mxu1 %v3556_v57  ;;  %v3520_v57 = vcombine.low %v127_v49, %v131_v50 }
  0xc5   :  { %970 = vmatprep.subr.bf16.mxu1 %v3565_v61  ;;  %v3528_v61 = vcombine.low %v135_v54, %v139_v56  ;;  %v4017_v54 = vld [vmem:[#allocation8 + $0xc8] ss:$16 sps:$4 sm:$0xff]   ;;  %v4025_v56 = vld [vmem:[#allocation8 + $0xec] ss:$16 sps:$4 sm:$0xff]  }
  0xc6   :  { %2666 = vmatpush1.bf16.msra.mxu0 %v4032_v27 }
  0xc7   :  { %2667 = vmatprep.subr.bf16.mxu0 %v4040_v29  ;;  %v199_v29 = vld [vmem:[#allocation5 + $0x358] sm:$0xff] }
  0xc8   :  { %971 = vmatpush1.bf16.msra.mxu1 %v3564_v63  ;;  %v4064_v63 = vld [vmem:[#allocation8 + $0x1c4] ss:$16 sps:$4 sm:$0xff]  }
  0xc9   :  { %972 = vmatprep.subr.bf16.mxu1 %v3573_v2  ;;  %v3536_v2 = vcombine.low %v143_v58, %v147_v59  ;;  %v4029_v58 = vld [vmem:[#allocation8 + $0x108] ss:$16 sps:$4 sm:$0xff]   ;;  %v4037_v59 = vld [vmem:[#allocation8 + $0x12c] ss:$16 sps:$4 sm:$0xff]  }
  0xca   :  { %2668 = vmatpush1.bf16.msra.mxu0 %v4038_v33  ;;  %v207_v33 = vld [vmem:[#allocation5 + $0x398] sm:$0xff] }
  0xcb   :  { %2669 = vmatprep.subr.bf16.mxu0 %v4046_v35 }
  0xcc   :  { %973 = vmatpush1.bf16.msra.mxu1 %v3572_v4  ;;  %v4070_v4 = vld [vmem:[#allocation8 + $0x1e4] ss:$16 sps:$4 sm:$0xff]  }
  0xcd   :  { %974 = vmatprep.subr.bf16.mxu1 %v3581_v8  ;;  %v3544_v8 = vcombine.low %v151_v62, %v155_v1  ;;  %v4041_v62 = vld [vmem:[#allocation8 + $0x148] ss:$16 sps:$4 sm:$0xff]   ;;  %v4055_v1 = vld [vmem:[#allocation8 + $0x18c] ss:$16 sps:$4 sm:$0xff]  }
  0xce   :  { %2670 = vmatpush1.bf16.msra.mxu0 %v4044_v39 }
  0xcf   :  { %2671 = vmatprep.subr.bf16.mxu0 %v4052_v41  ;;  %v3608_v41 = vcombine.low %v215_v37, %v219_v38 }
  0xd0   :  { %975 = vmatpush1.bf16.msra.mxu1 %v3580_v10  ;;  %v3553_v10 = vcombine.high %v159_v3, %v163_v6  ;;  %v4059_v3 = vld [vmem:[#allocation8 + $0x1a8] ss:$16 sps:$4 sm:$0xff]   ;;  %v4073_v6 = vld [vmem:[#allocation8 + $0x1ec] ss:$16 sps:$4 sm:$0xff]  }
  0xd1   :  { %976 = vmatprep.subr.bf16.mxu1 %v3589_v14  ;;  %v3561_v14 = vcombine.high %v167_v11, %v171_v12  ;;  %v4733_v12 = vld [vmem:[#allocation7] sm:$0xff] }
  0xd2   :  { %2672 = vmatpush1.bf16.msra.mxu0 %v4050_v45  ;;  %v3987_v45 = vld [vmem:[#allocation8 + $0x28] ss:$16 sps:$4 sm:$0xff]  }
  0xd3   :  { %2673 = vmatprep.subr.bf16.mxu0 %v4058_v47  ;;  %v3993_v47 = vld [vmem:[#allocation8 + $0x48] ss:$16 sps:$4 sm:$0xff]  }
  0xd4   :  { %977 = vmatpush1.bf16.msra.mxu1 %v3588_v16  ;;  %v179_v16 = vld [vmem:[#allocation5 + $0x2b8] sm:$0xff] }
  0xd5   :  { %978 = vmatprep.subr.bf16.mxu1 %v3597_v22  ;;  %v3569_v20 = vcombine.high %v175_v15, %v179_v16  ;;  %v187_v22 = vld [vmem:[#allocation5 + $0x2f8] sm:$0xff]  ;;  %v3568_v23 = vcombine.low %v175_v15, %v179_v16 }
  0xd6   :  { %2674 = vmatpush1.bf16.msra.mxu0 %v4056_v51  ;;  %v3576_v27 = vcombine.low %v183_v21, %v187_v22  ;;  %v4005_v51 = vld [vmem:[#allocation8 + $0x88] ss:$16 sps:$4 sm:$0xff]  }
  0xd7   :  { %2675 = vmatprep.subr.bf16.mxu0 %v4064_v63  ;;  %v4049_v63 = vld [vmem:[#allocation8 + $0x16c] ss:$16 sps:$4 sm:$0xff]  }
  0xd8   :  { %979 = vmatpush1.bf16.msra.mxu1 %v3596_v24  ;;  %v3577_v24 = vcombine.high %v183_v21, %v187_v22 }
  0xd9   :  { %980 = vmatprep.subr.bf16.mxu1 %v3605_v28  ;;  %v3585_v28 = vcombine.high %v191_v25, %v195_v26 }
  0xda   :  { %2676 = vmatpush1.bf16.msra.mxu0 %v4062_v17  ;;  %v4053_v17 = vld [vmem:[#allocation8 + $0x188] ss:$16 sps:$4 sm:$0xff]  }
  0xdb   :  { %2677 = vmatprep.subr.bf16.mxu0 %v4070_v4  ;;  %v4067_v4 = vld [vmem:[#allocation8 + $0x1cc] ss:$16 sps:$4 sm:$0xff]  }
  0xdc   :  { %981 = vmatpush1.bf16.msra.mxu1 %v3604_v30  ;;  %v203_v30 = vld [vmem:[#allocation5 + $0x378] sm:$0xff] }
  0xdd   :  { %1032 = vmatprep.subr.bf16.mxu1 %v3489_v34  ;;  %v3593_v32 = vcombine.high %v199_v29, %v203_v30  ;;  %v211_v34 = vld [vmem:[#allocation5 + $0x3b8] sm:$0xff]  ;;  %v3592_v35 = vcombine.low %v199_v29, %v203_v30 }
  0xde   :  { %2678 = vmatpush1.bf16.msra.mxu0 %v4068_v7  ;;  %v3600_v39 = vcombine.low %v207_v33, %v211_v34  ;;  %v4071_v7 = vld [vmem:[#allocation8 + $0x1e8] ss:$16 sps:$4 sm:$0xff]   ;;  %v4082_v30 = vld [vmem:[#allocation8 + $0x224] ss:$16 sps:$4 sm:$0xff]  }
  0xdf   :  { %983 = vmatmul.mubr.bf16.vlgmr.msra.gmra.mrb[4].mxu1 %v4720_v55  ;;  %2688 = vmatprep.subr.bf16.mxu0 %v4076_v9  ;;  %v222_v9 = vlaneseq }
  0xe0   :  { %1033 = vmatpush1.bf16.msra.mxu1 %v3488_v36  ;;  %1064 = vmatprep.mubr.bf16.mxu1 %v4714_v18  ;;  %v3521_v18 = vcombine.high %v127_v49, %v131_v50  ;;  %v3601_v36 = vcombine.high %v207_v33, %v211_v34  ;;  %v3999_v49 = vld [vmem:[#allocation8 + $0x68] ss:$16 sps:$4 sm:$0xff]   ;;  %v4007_v50 = vld [vmem:[#allocation8 + $0x8c] ss:$16 sps:$4 sm:$0xff]   ;;  %v4088_v34 = vld [vmem:[#allocation8 + $0x244] ss:$16 sps:$4 sm:$0xff]  }
  0xe1   :  { %1034 = vmatprep.subr.bf16.mxu1 %v3497_v40  ;;  %v3609_v40 = vcombine.high %v215_v37, %v219_v38  ;;  %v4083_v33 = vld [vmem:[#allocation8 + $0x228] ss:$16 sps:$4 sm:$0xff]   ;;  %v4094_v38 = vld [vmem:[#allocation8 + $0x264] ss:$16 sps:$4 sm:$0xff]  }
  0xe2   :  { %v4089_v37 = vld [vmem:[#allocation8 + $0x248] ss:$16 sps:$4 sm:$0xff]  }
  0xe4   :  { %1035 = vmatpush1.bf16.msra.mxu1 %v3496_v42  ;;  %v3983_v42 = vld [vmem:[#allocation8 + $0xc] ss:$16 sps:$4 sm:$0xff]  }
  0xe5   :  { %1036 = vmatprep.subr.bf16.mxu1 %v3505_v46  ;;  %v3995_v46 = vld [vmem:[#allocation8 + $0x4c] ss:$16 sps:$4 sm:$0xff]  }
  0xe8   :  { %1037 = vmatpush1.bf16.msra.mxu1 %v3504_v48  ;;  %v4001_v48 = vld [vmem:[#allocation8 + $0x6c] ss:$16 sps:$4 sm:$0xff]  }
  0xe9   :  { %1038 = vmatprep.subr.bf16.mxu1 %v3513_v52  ;;  %v4013_v52 = vld [vmem:[#allocation8 + $0xac] ss:$16 sps:$4 sm:$0xff]  }
  0xec   :  { %1039 = vmatpush1.bf16.msra.mxu1 %v3512_v53  ;;  %v4011_v53 = vld [vmem:[#allocation8 + $0xa8] ss:$16 sps:$4 sm:$0xff]  }
  0xed   :  { %1040 = vmatprep.subr.bf16.mxu1 %v3521_v18  ;;  %v4023_v18 = vld [vmem:[#allocation8 + $0xe8] ss:$16 sps:$4 sm:$0xff]  }
  0xf0   :  { %1041 = vmatpush1.bf16.msra.mxu1 %v3520_v57  ;;  %v4031_v57 = vld [vmem:[#allocation8 + $0x10c] ss:$16 sps:$4 sm:$0xff]  }
  0xf1   :  { %1042 = vmatprep.subr.bf16.mxu1 %v3529_v60  ;;  %v4035_v60 = vld [vmem:[#allocation8 + $0x128] ss:$16 sps:$4 sm:$0xff]  }
  0xf4   :  { %1043 = vmatpush1.bf16.msra.mxu1 %v3528_v61  ;;  %v4043_v61 = vld [vmem:[#allocation8 + $0x14c] ss:$16 sps:$4 sm:$0xff]  }
  0xf5   :  { %1044 = vmatprep.subr.bf16.mxu1 %v3537_v0  ;;  %v4047_v0 = vld [vmem:[#allocation8 + $0x168] ss:$16 sps:$4 sm:$0xff]  }
  0xf8   :  { %1045 = vmatpush1.bf16.msra.mxu1 %v3536_v2  ;;  %v4061_v2 = vld [vmem:[#allocation8 + $0x1ac] ss:$16 sps:$4 sm:$0xff]  }
  0xf9   :  { %1046 = vmatprep.subr.bf16.mxu1 %v3545_v5  ;;  %v4065_v5 = vld [vmem:[#allocation8 + $0x1c8] ss:$16 sps:$4 sm:$0xff]  }
  0xfc   :  { %1047 = vmatpush1.bf16.msra.mxu1 %v3544_v8  ;;  %v4079_v8 = vld [vmem:[#allocation8 + $0x20c] ss:$16 sps:$4 sm:$0xff]  }
  0xfd   :  { %1048 = vmatprep.subr.bf16.mxu1 %v3553_v10  ;;  %v4728_v10 = vshrl.u32 %v222_v9, 7  ;;  %v4145_v9 = vld [vmem:[#allocation8 + $0x36c] ss:$16 sps:$4 sm:$0xff]  }
  0xff   :  { %v4731_v11 = vsub.s32 0, %v4728_v10 }
 0x100   :  { %1049 = vmatpush1.bf16.msra.mxu1 %v3552_v13  ;;  %v4736_v13 = vsub.s32 1, %v4728_v10 }
 0x101   :  { %1050 = vmatprep.subr.bf16.mxu1 %v3561_v14  ;;  %v225_v14 = vrot.slane %v4733_v12, %v4731_v11 }
 0x102   :  { %v229_v15 = vrot.slane %v4733_v12, %v4736_v13 }
 0x104   :  { %1051 = vmatpush1.bf16.msra.mxu1 %v3560_v19 }
 0x105   :  { %1052 = vmatprep.subr.bf16.mxu1 %v3569_v20 }
 0x108   :  { %1053 = vmatpush1.bf16.msra.mxu1 %v3568_v23 }
 0x109   :  { %1054 = vmatprep.subr.bf16.mxu1 %v3577_v24 }
 0x10c   :  { %1055 = vmatpush1.bf16.msra.mxu1 %v3576_v27  ;;  %v4074_v27 = vld [vmem:[#allocation8 + $0x200] ss:$16 sps:$4 sm:$0xff]  }
 0x10d   :  { %1056 = vmatprep.subr.bf16.mxu1 %v3585_v28  ;;  %v4077_v28 = vld [vmem:[#allocation8 + $0x208] ss:$16 sps:$4 sm:$0xff]  }
 0x110   :  { %1057 = vmatpush1.bf16.msra.mxu1 %v3584_v31  ;;  %v4085_v31 = vld [vmem:[#allocation8 + $0x22c] ss:$16 sps:$4 sm:$0xff]  }
 0x111   :  { %1058 = vmatprep.subr.bf16.mxu1 %v3593_v32  ;;  %v4080_v32 = vld [vmem:[#allocation8 + $0x220] ss:$16 sps:$4 sm:$0xff]  }
 0x114   :  { %1059 = vmatpush1.bf16.msra.mxu1 %v3592_v35  ;;  %v4091_v35 = vld [vmem:[#allocation8 + $0x24c] ss:$16 sps:$4 sm:$0xff]  }
 0x115   :  { %1060 = vmatprep.subr.bf16.mxu1 %v3601_v36  ;;  %v4086_v36 = vld [vmem:[#allocation8 + $0x240] ss:$16 sps:$4 sm:$0xff]  }
 0x118   :  { %1061 = vmatpush1.bf16.msra.mxu1 %v3600_v39  ;;  %v4097_v39 = vld [vmem:[#allocation8 + $0x26c] ss:$16 sps:$4 sm:$0xff]  }
 0x119   :  { %1062 = vmatprep.subr.bf16.mxu1 %v3609_v40  ;;  %v4092_v40 = vld [vmem:[#allocation8 + $0x260] ss:$16 sps:$4 sm:$0xff]  }
 0x11c   :  { %1063 = vmatpush1.bf16.msra.mxu1 %v3608_v41  ;;  %v4095_v41 = vld [vmem:[#allocation8 + $0x268] ss:$16 sps:$4 sm:$0xff]  }
 0x11d   :  { %2811 = vmatprep.subr.bf16.mxu1 %v3983_v42  ;;  %v4100_v42 = vld [vmem:[#allocation8 + $0x284] ss:$16 sps:$4 sm:$0xff]  }
 0x11f   :  { %1065 = vmatmul.mubr.bf16.vlgmr.msra.gmra.mrb[8].mxu1 %v4720_v55  ;;  %v4019_v55 = vld [vmem:[#allocation8 + $0xcc] ss:$16 sps:$4 sm:$0xff]  }
 0x120   :  { %2812 = vmatpush1.bf16.msra.mxu1 %v3981_v43  ;;  %v4103_v43 = vld [vmem:[#allocation8 + $0x28c] ss:$16 sps:$4 sm:$0xff]  }
 0x121   :  { %2813 = vmatprep.subr.bf16.mxu1 %v3989_v44  ;;  %v4098_v44 = vld [vmem:[#allocation8 + $0x280] ss:$16 sps:$4 sm:$0xff]  }
 0x124   :  { %2814 = vmatpush1.bf16.msra.mxu1 %v3987_v45  ;;  %v4101_v45 = vld [vmem:[#allocation8 + $0x288] ss:$16 sps:$4 sm:$0xff]  }
 0x125   :  { %2815 = vmatprep.subr.bf16.mxu1 %v3995_v46 }
 0x128   :  { %2816 = vmatpush1.bf16.msra.mxu1 %v3993_v47  ;;  %v4106_v47 = vld [vmem:[#allocation8 + $0x2a4] ss:$16 sps:$4 sm:$0xff]  }
 0x129   :  { %2817 = vmatprep.subr.bf16.mxu1 %v4001_v48  ;;  %v4109_v48 = vld [vmem:[#allocation8 + $0x2ac] ss:$16 sps:$4 sm:$0xff]  }
 0x12c   :  { %2818 = vmatpush1.bf16.msra.mxu1 %v3999_v49 }
 0x12d   :  { %2819 = vmatprep.subr.bf16.mxu1 %v4007_v50 }
 0x130   :  { %2820 = vmatpush1.bf16.msra.mxu1 %v4005_v51 }
 0x131   :  { %2821 = vmatprep.subr.bf16.mxu1 %v4013_v52  ;;  %v4104_v52 = vld [vmem:[#allocation8 + $0x2a0] ss:$16 sps:$4 sm:$0xff]  }
 0x134   :  { %2822 = vmatpush1.bf16.msra.mxu1 %v4011_v53  ;;  %v4107_v53 = vld [vmem:[#allocation8 + $0x2a8] ss:$16 sps:$4 sm:$0xff]  }
 0x135   :  { %2823 = vmatprep.subr.bf16.mxu1 %v4019_v55  ;;  %v4112_v55 = vld [vmem:[#allocation8 + $0x2c4] ss:$16 sps:$4 sm:$0xff]  }
 0x138   :  { %2824 = vmatpush1.bf16.msra.mxu1 %v4017_v54  ;;  %v4115_v54 = vld [vmem:[#allocation8 + $0x2cc] ss:$16 sps:$4 sm:$0xff]  }
 0x139   :  { %2825 = vmatprep.subr.bf16.mxu1 %v4025_v56  ;;  %v4110_v56 = vld [vmem:[#allocation8 + $0x2c0] ss:$16 sps:$4 sm:$0xff]  }
 0x13c   :  { %2826 = vmatpush1.bf16.msra.mxu1 %v4023_v18  ;;  %v4113_v18 = vld [vmem:[#allocation8 + $0x2c8] ss:$16 sps:$4 sm:$0xff]  }
 0x13d   :  { %2827 = vmatprep.subr.bf16.mxu1 %v4031_v57  ;;  %v4118_v57 = vld [vmem:[#allocation8 + $0x2e4] ss:$16 sps:$4 sm:$0xff]  }
 0x140   :  { %2828 = vmatpush1.bf16.msra.mxu1 %v4029_v58  ;;  %v4121_v58 = vld [vmem:[#allocation8 + $0x2ec] ss:$16 sps:$4 sm:$0xff]  }
 0x141   :  { %2829 = vmatprep.subr.bf16.mxu1 %v4037_v59  ;;  %v4116_v59 = vld [vmem:[#allocation8 + $0x2e0] ss:$16 sps:$4 sm:$0xff]  }
 0x144   :  { %2830 = vmatpush1.bf16.msra.mxu1 %v4035_v60  ;;  %v4119_v60 = vld [vmem:[#allocation8 + $0x2e8] ss:$16 sps:$4 sm:$0xff]  }
 0x145   :  { %2831 = vmatprep.subr.bf16.mxu1 %v4043_v61  ;;  %v4124_v61 = vld [vmem:[#allocation8 + $0x304] ss:$16 sps:$4 sm:$0xff]  }
 0x148   :  { %2832 = vmatpush1.bf16.msra.mxu1 %v4041_v62  ;;  %v4127_v62 = vld [vmem:[#allocation8 + $0x30c] ss:$16 sps:$4 sm:$0xff]  }
 0x149   :  { %2833 = vmatprep.subr.bf16.mxu1 %v4049_v63  ;;  %v4122_v63 = vld [vmem:[#allocation8 + $0x300] ss:$16 sps:$4 sm:$0xff]  }
 0x14c   :  { %2834 = vmatpush1.bf16.msra.mxu1 %v4047_v0  ;;  %v4125_v0 = vld [vmem:[#allocation8 + $0x308] ss:$16 sps:$4 sm:$0xff]  }
 0x14d   :  { %2835 = vmatprep.subr.bf16.mxu1 %v4055_v1  ;;  %v4130_v1 = vld [vmem:[#allocation8 + $0x324] ss:$16 sps:$4 sm:$0xff]  }
 0x150   :  { %2836 = vmatpush1.bf16.msra.mxu1 %v4053_v17  ;;  %v4133_v17 = vld [vmem:[#allocation8 + $0x32c] ss:$16 sps:$4 sm:$0xff]  }
 0x151   :  { %2837 = vmatprep.subr.bf16.mxu1 %v4061_v2  ;;  %v4128_v2 = vld [vmem:[#allocation8 + $0x320] ss:$16 sps:$4 sm:$0xff]  }
 0x154   :  { %2838 = vmatpush1.bf16.msra.mxu1 %v4059_v3  ;;  %v4131_v3 = vld [vmem:[#allocation8 + $0x328] ss:$16 sps:$4 sm:$0xff]  }
 0x155   :  { %2839 = vmatprep.subr.bf16.mxu1 %v4067_v4  ;;  %v4136_v4 = vld [vmem:[#allocation8 + $0x344] ss:$16 sps:$4 sm:$0xff]  }
 0x158   :  { %2840 = vmatpush1.bf16.msra.mxu1 %v4065_v5  ;;  %v4139_v5 = vld [vmem:[#allocation8 + $0x34c] ss:$16 sps:$4 sm:$0xff]  }
 0x159   :  { %2841 = vmatprep.subr.bf16.mxu1 %v4073_v6  ;;  %v4134_v6 = vld [vmem:[#allocation8 + $0x340] ss:$16 sps:$4 sm:$0xff]  }
 0x15c   :  { %2842 = vmatpush1.bf16.msra.mxu1 %v4071_v7  ;;  %v4137_v7 = vld [vmem:[#allocation8 + $0x348] ss:$16 sps:$4 sm:$0xff]  }
 0x15d   :  { %2852 = vmatprep.subr.bf16.mxu1 %v4079_v8  ;;  %v4142_v8 = vld [vmem:[#allocation8 + $0x364] ss:$16 sps:$4 sm:$0xff]  }
 0x172   :  { %v943_v16 = vpop.f32.mrb[0].mxu1 }
 0x173   :  { %v944_v19 = vadd.f32 %v943_v16, %v225_v14  ;;  %v945_v20 = vpop.f32.mrb[1].mxu1  ;;  %v4140_v14 = vld [vmem:[#allocation8 + $0x360] ss:$16 sps:$4 sm:$0xff]   ;;  %v4148_v16 = vld [vmem:[#allocation8 + $0x384] ss:$16 sps:$4 sm:$0xff]  }
 0x174   :  { %v946_v21 = vadd.f32 %v945_v20, %v229_v15  ;;  %v947_v22 = vpop.f32.mrb[2].mxu1  ;;  %v4742_v46 = vpop.f32.mrb[0].mxu0  ;;  %v4143_v15 = vld [vmem:[#allocation8 + $0x368] ss:$16 sps:$4 sm:$0xff]   ;;  %v4146_v20 = vld [vmem:[#allocation8 + $0x380] ss:$16 sps:$4 sm:$0xff]  }
 0x175   :  { %v1073_v23 = vmax.f32 %v944_v19, 0.0  ;;  %v948_v24 = vpop.f32.mrb[3].mxu1  ;;  %v4744_v49 = vpop.f32.mrb[1].mxu0  ;;  %v4151_v19 = vld [vmem:[#allocation8 + $0x38c] ss:$16 sps:$4 sm:$0xff]  }
 0x176   :  { %v1074_v25 = vmax.f32 %v946_v21, 0.0  ;;  %v1029_v50 = vpop.f32.mrb[2].mxu0  ;;  %v4149_v21 = vld [vmem:[#allocation8 + $0x388] ss:$16 sps:$4 sm:$0xff]   ;;  %v4154_v22 = vld [vmem:[#allocation8 + $0x3a4] ss:$16 sps:$4 sm:$0xff]  }
 0x177   :  { %v1081_v29 = vpack.c.bf16 %v1073_v23, %v1073_v23  ;;  %v1030_v51 = vpop.f32.mrb[3].mxu0  ;;  %v4157_v23 = vld [vmem:[#allocation8 + $0x3ac] ss:$16 sps:$4 sm:$0xff]   ;;  %v244_v24 = vsub.s32 5, %v4728_v10  ;;  %v4172_v50 = vld [vmem:[#allocation8 + $0x404] ss:$16 sps:$4 sm:$0xff]  }
 0x178   :  { %v1082_v26 = vpack.c.bf16 %v1074_v25, %v1074_v25  ;;  %v232_v25 = vsub.s32 2, %v4728_v10  ;;  %v4175_v51 = vld [vmem:[#allocation8 + $0x40c] ss:$16 sps:$4 sm:$0xff]  }
 0x17a   :  { %2679 = vmatprep.mubr.bf16.mxu0 %v1082_v26  ;;  %2843 = vmatprep.mubr.bf16.mxu1 %v1082_v26  ;;  %v4152_v26 = vld [vmem:[#allocation8 + $0x3a0] ss:$16 sps:$4 sm:$0xff]  }
 0x17b   :  { %2680 = vmatmul.mubr.bf16.vlgmr.msra.gmra.mrb[4].mxu0 %v1081_v29  ;;  %2844 = vmatmul.mubr.bf16.vlgmr.msra.gmra.mrb[12].mxu1 %v1081_v29  ;;  %v4160_v29 = vld [vmem:[#allocation8 + $0x3c4] ss:$16 sps:$4 sm:$0xff]  }
 0x17c   :  { %2689 = vmatpush1.bf16.msra.mxu0 %v4074_v27  ;;  %2853 = vmatpush1.bf16.msra.mxu1 %v4077_v28  ;;  %v4155_v27 = vld [vmem:[#allocation8 + $0x3a8] ss:$16 sps:$4 sm:$0xff]   ;;  %v236_v28 = vsub.s32 3, %v4728_v10 }
 0x17d   :  { %2690 = vmatprep.subr.bf16.mxu0 %v4082_v30  ;;  %2854 = vmatprep.subr.bf16.mxu1 %v4085_v31  ;;  %v4163_v30 = vld [vmem:[#allocation8 + $0x3cc] ss:$16 sps:$4 sm:$0xff]   ;;  %v245_v31 = vrot.slane %v4733_v12, %v244_v24  ;;  %v4212_v24 = vld [vmem:[#allocation8 + $0x4e0] ss:$16 sps:$4 sm:$0xff]  }
 0x180   :  { %2691 = vmatpush1.bf16.msra.mxu0 %v4080_v32  ;;  %2855 = vmatpush1.bf16.msra.mxu1 %v4083_v33  ;;  %v233_v32 = vrot.slane %v4733_v12, %v232_v25  ;;  %v4158_v33 = vld [vmem:[#allocation8 + $0x3c0] ss:$16 sps:$4 sm:$0xff]  }
 0x181   :  { %2692 = vmatprep.subr.bf16.mxu0 %v4088_v34  ;;  %2856 = vmatprep.subr.bf16.mxu1 %v4091_v35  ;;  %v4161_v34 = vld [vmem:[#allocation8 + $0x3c8] ss:$16 sps:$4 sm:$0xff]   ;;  %v237_v35 = vrot.slane %v4733_v12, %v236_v28 }
 0x184   :  { %2693 = vmatpush1.bf16.msra.mxu0 %v4086_v36  ;;  %2857 = vmatpush1.bf16.msra.mxu1 %v4089_v37  ;;  %v4166_v36 = vld [vmem:[#allocation8 + $0x3e4] ss:$16 sps:$4 sm:$0xff]   ;;  %v4169_v37 = vld [vmem:[#allocation8 + $0x3ec] ss:$16 sps:$4 sm:$0xff]  }
 0x185   :  { %2694 = vmatprep.subr.bf16.mxu0 %v4094_v38  ;;  %2858 = vmatprep.subr.bf16.mxu1 %v4097_v39  ;;  %v1028_v39 = vadd.f32 %v4744_v49, %v245_v31  ;;  %v4170_v49 = vld [vmem:[#allocation8 + $0x400] ss:$16 sps:$4 sm:$0xff]   ;;  %v4221_v31 = vld [vmem:[#allocation8 + $0x508] ss:$16 sps:$4 sm:$0xff]  }
 0x188   :  { %2695 = vmatpush1.bf16.msra.mxu0 %v4092_v40  ;;  %2859 = vmatpush1.bf16.msra.mxu1 %v4095_v41 }
 0x189   :  { %2696 = vmatprep.subr.bf16.mxu0 %v4100_v42  ;;  %2860 = vmatprep.subr.bf16.mxu1 %v4103_v43 }
 0x18c   :  { %2697 = vmatpush1.bf16.msra.mxu0 %v4098_v44  ;;  %2861 = vmatpush1.bf16.msra.mxu1 %v4101_v45  ;;  %v4164_v44 = vld [vmem:[#allocation8 + $0x3e0] ss:$16 sps:$4 sm:$0xff]   ;;  %v4167_v45 = vld [vmem:[#allocation8 + $0x3e8] ss:$16 sps:$4 sm:$0xff]  }
 0x18d   :  { %2698 = vmatprep.subr.bf16.mxu0 %v4106_v47  ;;  %2862 = vmatprep.subr.bf16.mxu1 %v4109_v48 }
 0x190   :  { %2699 = vmatpush1.bf16.msra.mxu0 %v4104_v52  ;;  %2863 = vmatpush1.bf16.msra.mxu1 %v4107_v53  ;;  %v1078_v53 = vmax.f32 %v1028_v39, 0.0  ;;  %v4233_v39 = vld [vmem:[#allocation8 + $0x548] ss:$16 sps:$4 sm:$0xff]  }
 0x191   :  { %2700 = vmatprep.subr.bf16.mxu0 %v4112_v55  ;;  %2864 = vmatprep.subr.bf16.mxu1 %v4115_v54  ;;  %v4173_v54 = vld [vmem:[#allocation8 + $0x408] ss:$16 sps:$4 sm:$0xff]  }
 0x194   :  { %2701 = vmatpush1.bf16.msra.mxu0 %v4110_v56  ;;  %2865 = vmatpush1.bf16.msra.mxu1 %v4113_v18  ;;  %v4178_v18 = vld [vmem:[#allocation8 + $0x424] ss:$16 sps:$4 sm:$0xff]  }
 0x195   :  { %2702 = vmatprep.subr.bf16.mxu0 %v4118_v57  ;;  %2866 = vmatprep.subr.bf16.mxu1 %v4121_v58  ;;  %v4181_v57 = vld [vmem:[#allocation8 + $0x42c] ss:$16 sps:$4 sm:$0xff]   ;;  %v1086_v58 = vpack.c.bf16 %v1078_v53, %v1078_v53 }
 0x198   :  { %2703 = vmatpush1.bf16.msra.mxu0 %v4116_v59  ;;  %2867 = vmatpush1.bf16.msra.mxu1 %v4119_v60  ;;  %v4176_v59 = vld [vmem:[#allocation8 + $0x420] ss:$16 sps:$4 sm:$0xff]   ;;  %v4179_v60 = vld [vmem:[#allocation8 + $0x428] ss:$16 sps:$4 sm:$0xff]  }
 0x199   :  { %2704 = vmatprep.subr.bf16.mxu0 %v4124_v61  ;;  %2868 = vmatprep.subr.bf16.mxu1 %v4127_v62  ;;  %v4184_v61 = vld [vmem:[#allocation8 + $0x444] ss:$16 sps:$4 sm:$0xff]   ;;  %v4187_v62 = vld [vmem:[#allocation8 + $0x44c] ss:$16 sps:$4 sm:$0xff]  }
 0x19c   :  { %2705 = vmatpush1.bf16.msra.mxu0 %v4122_v63  ;;  %2869 = vmatpush1.bf16.msra.mxu1 %v4125_v0  ;;  %v4182_v63 = vld [vmem:[#allocation8 + $0x440] ss:$16 sps:$4 sm:$0xff]   ;;  %v4185_v0 = vld [vmem:[#allocation8 + $0x448] ss:$16 sps:$4 sm:$0xff]  }
 0x19d   :  { %2706 = vmatprep.subr.bf16.mxu0 %v4130_v1  ;;  %2870 = vmatprep.subr.bf16.mxu1 %v4133_v17  ;;  %v4190_v1 = vld [vmem:[#allocation8 + $0x464] ss:$16 sps:$4 sm:$0xff]   ;;  %v4193_v17 = vld [vmem:[#allocation8 + $0x46c] ss:$16 sps:$4 sm:$0xff]  }
 0x1a0   :  { %2707 = vmatpush1.bf16.msra.mxu0 %v4128_v2  ;;  %2871 = vmatpush1.bf16.msra.mxu1 %v4131_v3  ;;  %v4188_v2 = vld [vmem:[#allocation8 + $0x460] ss:$16 sps:$4 sm:$0xff]   ;;  %v4191_v3 = vld [vmem:[#allocation8 + $0x468] ss:$16 sps:$4 sm:$0xff]  }
 0x1a1   :  { %2708 = vmatprep.subr.bf16.mxu0 %v4136_v4  ;;  %2872 = vmatprep.subr.bf16.mxu1 %v4139_v5  ;;  %v4196_v4 = vld [vmem:[#allocation8 + $0x484] ss:$16 sps:$4 sm:$0xff]   ;;  %v4199_v5 = vld [vmem:[#allocation8 + $0x48c] ss:$16 sps:$4 sm:$0xff]  }
 0x1a4   :  { %2709 = vmatpush1.bf16.msra.mxu0 %v4134_v6  ;;  %2873 = vmatpush1.bf16.msra.mxu1 %v4137_v7  ;;  %v4194_v6 = vld [vmem:[#allocation8 + $0x480] ss:$16 sps:$4 sm:$0xff]   ;;  %v4197_v7 = vld [vmem:[#allocation8 + $0x488] ss:$16 sps:$4 sm:$0xff]  }
 0x1a5   :  { %2710 = vmatprep.subr.bf16.mxu0 %v4142_v8  ;;  %2874 = vmatprep.subr.bf16.mxu1 %v4145_v9  ;;  %v4202_v8 = vld [vmem:[#allocation8 + $0x4a4] ss:$16 sps:$4 sm:$0xff]   ;;  %v4205_v9 = vld [vmem:[#allocation8 + $0x4ac] ss:$16 sps:$4 sm:$0xff]  }
 0x1a8   :  { %2711 = vmatpush1.bf16.msra.mxu0 %v4140_v14  ;;  %2875 = vmatpush1.bf16.msra.mxu1 %v4143_v15  ;;  %v4200_v14 = vld [vmem:[#allocation8 + $0x4a0] ss:$16 sps:$4 sm:$0xff]   ;;  %v4203_v15 = vld [vmem:[#allocation8 + $0x4a8] ss:$16 sps:$4 sm:$0xff]  }
 0x1a9   :  { %2712 = vmatprep.subr.bf16.mxu0 %v4148_v16  ;;  %2876 = vmatprep.subr.bf16.mxu1 %v4151_v19  ;;  %v4208_v16 = vld [vmem:[#allocation8 + $0x4c4] ss:$16 sps:$4 sm:$0xff]   ;;  %v4211_v19 = vld [vmem:[#allocation8 + $0x4cc] ss:$16 sps:$4 sm:$0xff]  }
 0x1ac   :  { %2713 = vmatpush1.bf16.msra.mxu0 %v4146_v20  ;;  %2877 = vmatpush1.bf16.msra.mxu1 %v4149_v21  ;;  %v4206_v20 = vld [vmem:[#allocation8 + $0x4c0] ss:$16 sps:$4 sm:$0xff]   ;;  %v4209_v21 = vld [vmem:[#allocation8 + $0x4c8] ss:$16 sps:$4 sm:$0xff]  }
 0x1ad   :  { %2714 = vmatprep.subr.bf16.mxu0 %v4154_v22  ;;  %2878 = vmatprep.subr.bf16.mxu1 %v4157_v23  ;;  %v4214_v22 = vld [vmem:[#allocation8 + $0x4e4] ss:$16 sps:$4 sm:$0xff]   ;;  %v4217_v23 = vld [vmem:[#allocation8 + $0x4ec] ss:$16 sps:$4 sm:$0xff]  }
 0x1b0   :  { %2715 = vmatpush1.bf16.msra.mxu0 %v4152_v26  ;;  %2879 = vmatpush1.bf16.msra.mxu1 %v4155_v27  ;;  %v4215_v26 = vld [vmem:[#allocation8 + $0x4e8] ss:$16 sps:$4 sm:$0xff]   ;;  %v4220_v27 = vld [vmem:[#allocation8 + $0x504] ss:$16 sps:$4 sm:$0xff]  }
 0x1b1   :  { %2716 = vmatprep.subr.bf16.mxu0 %v4160_v29  ;;  %2880 = vmatprep.subr.bf16.mxu1 %v4163_v30  ;;  %v4223_v29 = vld [vmem:[#allocation8 + $0x50c] ss:$16 sps:$4 sm:$0xff]   ;;  %v4218_v30 = vld [vmem:[#allocation8 + $0x500] ss:$16 sps:$4 sm:$0xff]  }
 0x1b2   :  { %v984_v38 = vpop.f32.mrb[4].mxu1 }
 0x1b3   :  { %v985_v40 = vadd.f32 %v984_v38, %v233_v32  ;;  %v986_v41 = vpop.f32.mrb[5].mxu1  ;;  %v4226_v32 = vld [vmem:[#allocation8 + $0x524] ss:$16 sps:$4 sm:$0xff]   ;;  %v4230_v38 = vld [vmem:[#allocation8 + $0x540] ss:$16 sps:$4 sm:$0xff]  }
 0x1b4   :  { %v987_v42 = vadd.f32 %v986_v41, %v237_v35  ;;  %2717 = vmatpush1.bf16.msra.mxu0 %v4158_v33  ;;  %2881 = vmatpush1.bf16.msra.mxu1 %v4161_v34  ;;  %v988_v43 = vpop.f32.mrb[6].mxu1  ;;  %v4229_v33 = vld [vmem:[#allocation8 + $0x52c] ss:$16 sps:$4 sm:$0xff]   ;;  %v4224_v34 = vld [vmem:[#allocation8 + $0x520] ss:$16 sps:$4 sm:$0xff]  }
 0x1b5   :  { %v1075_v47 = vmax.f32 %v985_v40, 0.0  ;;  %v989_v48 = vpop.f32.mrb[7].mxu1  ;;  %2718 = vmatprep.subr.bf16.mxu0 %v4166_v36  ;;  %2882 = vmatprep.subr.bf16.mxu1 %v4169_v37  ;;  %v4227_v35 = vld [vmem:[#allocation8 + $0x528] ss:$16 sps:$4 sm:$0xff]   ;;  %v4232_v36 = vld [vmem:[#allocation8 + $0x544] ss:$16 sps:$4 sm:$0xff]  }
 0x1b6   :  { %v1076_v52 = vmax.f32 %v987_v42, 0.0  ;;  %v4235_v37 = vld [vmem:[#allocation8 + $0x54c] ss:$16 sps:$4 sm:$0xff]   ;;  %v4238_v40 = vld [vmem:[#allocation8 + $0x564] ss:$16 sps:$4 sm:$0xff]  }
 0x1b7   :  { %v1083_v56 = vpack.c.bf16 %v1075_v47, %v1075_v47  ;;  %v4241_v41 = vld [vmem:[#allocation8 + $0x56c] ss:$16 sps:$4 sm:$0xff]   ;;  %v4236_v42 = vld [vmem:[#allocation8 + $0x560] ss:$16 sps:$4 sm:$0xff]   ;;  %v4239_v43 = vld [vmem:[#allocation8 + $0x568] ss:$16 sps:$4 sm:$0xff]  }
 0x1b8   :  { %v1084_v55 = vpack.c.bf16 %v1076_v52, %v1076_v52  ;;  %2719 = vmatpush1.bf16.msra.mxu0 %v4164_v44  ;;  %2883 = vmatpush1.bf16.msra.mxu1 %v4167_v45  ;;  %v4244_v44 = vld [vmem:[#allocation8 + $0x584] ss:$16 sps:$4 sm:$0xff]   ;;  %v4247_v45 = vld [vmem:[#allocation8 + $0x58c] ss:$16 sps:$4 sm:$0xff]   ;;  %v240_v47 = vsub.s32 4, %v4728_v10 }
 0x1b9   :  { %2729 = vmatprep.subr.bf16.mxu0 %v4172_v50  ;;  %2893 = vmatprep.subr.bf16.mxu1 %v4175_v51  ;;  %v4242_v48 = vld [vmem:[#allocation8 + $0x580] ss:$16 sps:$4 sm:$0xff]   ;;  %v4245_v50 = vld [vmem:[#allocation8 + $0x588] ss:$16 sps:$4 sm:$0xff]   ;;  %v4250_v51 = vld [vmem:[#allocation8 + $0x5a4] ss:$16 sps:$4 sm:$0xff]  }
 0x1ba   :  { %2720 = vmatprep.mubr.bf16.mxu0 %v1084_v55  ;;  %2884 = vmatprep.mubr.bf16.mxu1 %v1084_v55  ;;  %v4253_v52 = vld [vmem:[#allocation8 + $0x5ac] ss:$16 sps:$4 sm:$0xff]   ;;  %v241_v53 = vrot.slane %v4733_v12, %v240_v47  ;;  %v4248_v55 = vld [vmem:[#allocation8 + $0x5a0] ss:$16 sps:$4 sm:$0xff]  }
 0x1bb   :  { %2721 = vmatmul.mubr.bf16.vlgmr.msra.gmra.mrb[4].mxu0 %v1083_v56  ;;  %2885 = vmatmul.mubr.bf16.vlgmr.msra.gmra.mrb[12].mxu1 %v1083_v56  ;;  %v4256_v56 = vld [vmem:[#allocation8 + $0x5c4] ss:$16 sps:$4 sm:$0xff]   ;;  %v4308_v47 = vld [vmem:[#allocation8 + $0x6e0] ss:$16 sps:$4 sm:$0xff]  }
 0x1bc   :  { %2730 = vmatpush1.bf16.msra.mxu0 %v4170_v49  ;;  %2894 = vmatpush1.bf16.msra.mxu1 %v4173_v54  ;;  %v4251_v49 = vld [vmem:[#allocation8 + $0x5a8] ss:$16 sps:$4 sm:$0xff]   ;;  %v252_v54 = vsub.s32 7, %v4728_v10 }
 0x1bd   :  { %2731 = vmatprep.subr.bf16.mxu0 %v4178_v18  ;;  %2895 = vmatprep.subr.bf16.mxu1 %v4181_v57  ;;  %v4259_v18 = vld [vmem:[#allocation8 + $0x5cc] ss:$16 sps:$4 sm:$0xff]   ;;  %v1026_v57 = vadd.f32 %v4742_v46, %v241_v53  ;;  %v4317_v53 = vld [vmem:[#allocation8 + $0x708] ss:$16 sps:$4 sm:$0xff]  }
 0x1be   :  { %2761 = vmatprep.mubr.bf16.mxu0 %v1086_v58  ;;  %2925 = vmatprep.mubr.bf16.mxu1 %v1086_v58  ;;  %v4254_v58 = vld [vmem:[#allocation8 + $0x5c0] ss:$16 sps:$4 sm:$0xff]  }
 0x1c0   :  { %2732 = vmatpush1.bf16.msra.mxu0 %v4176_v59  ;;  %2896 = vmatpush1.bf16.msra.mxu1 %v4179_v60  ;;  %v4257_v59 = vld [vmem:[#allocation8 + $0x5c8] ss:$16 sps:$4 sm:$0xff]   ;;  %v253_v60 = vrot.slane %v4733_v12, %v252_v54  ;;  %v4320_v54 = vld [vmem:[#allocation8 + $0x720] ss:$16 sps:$4 sm:$0xff]  }
 0x1c1   :  { %2733 = vmatprep.subr.bf16.mxu0 %v4184_v61  ;;  %2897 = vmatprep.subr.bf16.mxu1 %v4187_v62  ;;  %v4262_v61 = vld [vmem:[#allocation8 + $0x5e4] ss:$16 sps:$4 sm:$0xff]   ;;  %v4265_v62 = vld [vmem:[#allocation8 + $0x5ec] ss:$16 sps:$4 sm:$0xff]  }
 0x1c4   :  { %2734 = vmatpush1.bf16.msra.mxu0 %v4182_v63  ;;  %2898 = vmatpush1.bf16.msra.mxu1 %v4185_v0  ;;  %v1077_v0 = vmax.f32 %v1026_v57, 0.0  ;;  %v4331_v57 = vld [vmem:[#allocation8 + $0x74c] ss:$16 sps:$4 sm:$0xff]  }
 0x1c5   :  { %2735 = vmatprep.subr.bf16.mxu0 %v4190_v1  ;;  %2899 = vmatprep.subr.bf16.mxu1 %v4193_v17  ;;  %v4260_v17 = vld [vmem:[#allocation8 + $0x5e0] ss:$16 sps:$4 sm:$0xff]  }
 0x1c8   :  { %2736 = vmatpush1.bf16.msra.mxu0 %v4188_v2  ;;  %2900 = vmatpush1.bf16.msra.mxu1 %v4191_v3  ;;  %v4263_v2 = vld [vmem:[#allocation8 + $0x5e8] ss:$16 sps:$4 sm:$0xff]  }
 0x1c9   :  { %2737 = vmatprep.subr.bf16.mxu0 %v4196_v4  ;;  %2901 = vmatprep.subr.bf16.mxu1 %v4199_v5  ;;  %v4268_v4 = vld [vmem:[#allocation8 + $0x604] ss:$16 sps:$4 sm:$0xff]   ;;  %v4271_v5 = vld [vmem:[#allocation8 + $0x60c] ss:$16 sps:$4 sm:$0xff]  }
 0x1cc   :  { %2738 = vmatpush1.bf16.msra.mxu0 %v4194_v6  ;;  %2902 = vmatpush1.bf16.msra.mxu1 %v4197_v7 }
 0x1cd   :  { %2739 = vmatprep.subr.bf16.mxu0 %v4202_v8  ;;  %2903 = vmatprep.subr.bf16.mxu1 %v4205_v9  ;;  %v1085_v8 = vpack.c.bf16 %v1077_v0, %v1077_v0  ;;  %v4266_v9 = vld [vmem:[#allocation8 + $0x600] ss:$16 sps:$4 sm:$0xff]   ;;  %v4335_v0 = vld [vmem:[#allocation8 + $0x768] ss:$16 sps:$4 sm:$0xff]  }
 0x1d0   :  { %2740 = vmatpush1.bf16.msra.mxu0 %v4200_v14  ;;  %2904 = vmatpush1.bf16.msra.mxu1 %v4203_v15  ;;  %v4269_v14 = vld [vmem:[#allocation8 + $0x608] ss:$16 sps:$4 sm:$0xff]   ;;  %v4274_v15 = vld [vmem:[#allocation8 + $0x624] ss:$16 sps:$4 sm:$0xff]  }
 0x1d1   :  { %2741 = vmatprep.subr.bf16.mxu0 %v4208_v16  ;;  %2905 = vmatprep.subr.bf16.mxu1 %v4211_v19  ;;  %v4277_v16 = vld [vmem:[#allocation8 + $0x62c] ss:$16 sps:$4 sm:$0xff]  }
 0x1d4   :  { %2742 = vmatpush1.bf16.msra.mxu0 %v4206_v20  ;;  %2906 = vmatpush1.bf16.msra.mxu1 %v4209_v21  ;;  %v4272_v20 = vld [vmem:[#allocation8 + $0x620] ss:$16 sps:$4 sm:$0xff]   ;;  %v4275_v21 = vld [vmem:[#allocation8 + $0x628] ss:$16 sps:$4 sm:$0xff]  }
 0x1d5   :  { %2743 = vmatprep.subr.bf16.mxu0 %v4214_v22  ;;  %2907 = vmatprep.subr.bf16.mxu1 %v4217_v23  ;;  %v4280_v22 = vld [vmem:[#allocation8 + $0x644] ss:$16 sps:$4 sm:$0xff]   ;;  %v4283_v23 = vld [vmem:[#allocation8 + $0x64c] ss:$16 sps:$4 sm:$0xff]  }
 0x1d8   :  { %2744 = vmatpush1.bf16.msra.mxu0 %v4212_v24  ;;  %2908 = vmatpush1.bf16.msra.mxu1 %v4215_v26  ;;  %v4278_v24 = vld [vmem:[#allocation8 + $0x640] ss:$16 sps:$4 sm:$0xff]   ;;  %v4281_v26 = vld [vmem:[#allocation8 + $0x648] ss:$16 sps:$4 sm:$0xff]  }
 0x1d9   :  { %2745 = vmatprep.subr.bf16.mxu0 %v4220_v27  ;;  %2909 = vmatprep.subr.bf16.mxu1 %v4223_v29  ;;  %v4286_v27 = vld [vmem:[#allocation8 + $0x664] ss:$16 sps:$4 sm:$0xff]   ;;  %v4289_v29 = vld [vmem:[#allocation8 + $0x66c] ss:$16 sps:$4 sm:$0xff]  }
 0x1dc   :  { %2746 = vmatpush1.bf16.msra.mxu0 %v4218_v30  ;;  %2910 = vmatpush1.bf16.msra.mxu1 %v4221_v31  ;;  %v4284_v30 = vld [vmem:[#allocation8 + $0x660] ss:$16 sps:$4 sm:$0xff]   ;;  %v4287_v31 = vld [vmem:[#allocation8 + $0x668] ss:$16 sps:$4 sm:$0xff]  }
 0x1dd   :  { %2747 = vmatprep.subr.bf16.mxu0 %v4226_v32  ;;  %2911 = vmatprep.subr.bf16.mxu1 %v4229_v33  ;;  %v4292_v32 = vld [vmem:[#allocation8 + $0x684] ss:$16 sps:$4 sm:$0xff]   ;;  %v4295_v33 = vld [vmem:[#allocation8 + $0x68c] ss:$16 sps:$4 sm:$0xff]  }
 0x1e0   :  { %2748 = vmatpush1.bf16.msra.mxu0 %v4224_v34  ;;  %2912 = vmatpush1.bf16.msra.mxu1 %v4227_v35  ;;  %v4290_v34 = vld [vmem:[#allocation8 + $0x680] ss:$16 sps:$4 sm:$0xff]   ;;  %v4293_v35 = vld [vmem:[#allocation8 + $0x688] ss:$16 sps:$4 sm:$0xff]  }
 0x1e1   :  { %2749 = vmatprep.subr.bf16.mxu0 %v4232_v36  ;;  %2913 = vmatprep.subr.bf16.mxu1 %v4235_v37  ;;  %v4298_v36 = vld [vmem:[#allocation8 + $0x6a4] ss:$16 sps:$4 sm:$0xff]   ;;  %v4301_v37 = vld [vmem:[#allocation8 + $0x6ac] ss:$16 sps:$4 sm:$0xff]  }
 0x1e4   :  { %2750 = vmatpush1.bf16.msra.mxu0 %v4230_v38  ;;  %2914 = vmatpush1.bf16.msra.mxu1 %v4233_v39  ;;  %v4296_v38 = vld [vmem:[#allocation8 + $0x6a0] ss:$16 sps:$4 sm:$0xff]   ;;  %v4299_v39 = vld [vmem:[#allocation8 + $0x6a8] ss:$16 sps:$4 sm:$0xff]  }
 0x1e5   :  { %2751 = vmatprep.subr.bf16.mxu0 %v4238_v40  ;;  %2915 = vmatprep.subr.bf16.mxu1 %v4241_v41  ;;  %v4304_v40 = vld [vmem:[#allocation8 + $0x6c4] ss:$16 sps:$4 sm:$0xff]   ;;  %v4307_v41 = vld [vmem:[#allocation8 + $0x6cc] ss:$16 sps:$4 sm:$0xff]  }
 0x1e8   :  { %2752 = vmatpush1.bf16.msra.mxu0 %v4236_v42  ;;  %2916 = vmatpush1.bf16.msra.mxu1 %v4239_v43  ;;  %v4302_v42 = vld [vmem:[#allocation8 + $0x6c0] ss:$16 sps:$4 sm:$0xff]   ;;  %v4305_v43 = vld [vmem:[#allocation8 + $0x6c8] ss:$16 sps:$4 sm:$0xff]  }
 0x1e9   :  { %2753 = vmatprep.subr.bf16.mxu0 %v4244_v44  ;;  %2917 = vmatprep.subr.bf16.mxu1 %v4247_v45  ;;  %v4310_v44 = vld [vmem:[#allocation8 + $0x6e4] ss:$16 sps:$4 sm:$0xff]   ;;  %v4313_v45 = vld [vmem:[#allocation8 + $0x6ec] ss:$16 sps:$4 sm:$0xff]  }
 0x1ec   :  { %2754 = vmatpush1.bf16.msra.mxu0 %v4242_v48  ;;  %2918 = vmatpush1.bf16.msra.mxu1 %v4245_v50  ;;  %v4311_v48 = vld [vmem:[#allocation8 + $0x6e8] ss:$16 sps:$4 sm:$0xff]   ;;  %v4316_v50 = vld [vmem:[#allocation8 + $0x704] ss:$16 sps:$4 sm:$0xff]  }
 0x1ed   :  { %2755 = vmatprep.subr.bf16.mxu0 %v4250_v51  ;;  %2919 = vmatprep.subr.bf16.mxu1 %v4253_v52  ;;  %v4319_v51 = vld [vmem:[#allocation8 + $0x70c] ss:$16 sps:$4 sm:$0xff]   ;;  %v4314_v52 = vld [vmem:[#allocation8 + $0x700] ss:$16 sps:$4 sm:$0xff]  }
 0x1f0   :  { %2756 = vmatpush1.bf16.msra.mxu0 %v4248_v55  ;;  %2920 = vmatpush1.bf16.msra.mxu1 %v4251_v49  ;;  %v4322_v55 = vld [vmem:[#allocation8 + $0x724] ss:$16 sps:$4 sm:$0xff]   ;;  %v4325_v49 = vld [vmem:[#allocation8 + $0x72c] ss:$16 sps:$4 sm:$0xff]  }
 0x1f1   :  { %2757 = vmatprep.subr.bf16.mxu0 %v4256_v56  ;;  %2921 = vmatprep.subr.bf16.mxu1 %v4259_v18  ;;  %v4323_v56 = vld [vmem:[#allocation8 + $0x728] ss:$16 sps:$4 sm:$0xff]   ;;  %v4328_v18 = vld [vmem:[#allocation8 + $0x744] ss:$16 sps:$4 sm:$0xff]  }
 0x1f2   :  { %v4762_v63 = vpop.f32.mrb[8].mxu1 }
 0x1f3   :  { %v1068_v1 = vpop.f32.mrb[9].mxu1 }
 0x1f4   :  { %2758 = vmatpush1.bf16.msra.mxu0 %v4254_v58  ;;  %2922 = vmatpush1.bf16.msra.mxu1 %v4257_v59  ;;  %v1069_v3 = vadd.f32 %v1068_v1, %v253_v60  ;;  %v1070_v46 = vpop.f32.mrb[10].mxu1  ;;  %v4326_v58 = vld [vmem:[#allocation8 + $0x740] ss:$16 sps:$4 sm:$0xff]   ;;  %v4329_v59 = vld [vmem:[#allocation8 + $0x748] ss:$16 sps:$4 sm:$0xff]  }
 0x1f5   :  { %2759 = vmatprep.subr.bf16.mxu0 %v4262_v61  ;;  %2923 = vmatprep.subr.bf16.mxu1 %v4265_v62  ;;  %v1071_v6 = vpop.f32.mrb[11].mxu1  ;;  %v4334_v60 = vld [vmem:[#allocation8 + $0x764] ss:$16 sps:$4 sm:$0xff]   ;;  %v4337_v61 = vld [vmem:[#allocation8 + $0x76c] ss:$16 sps:$4 sm:$0xff]   ;;  %v248_v46 = vsub.s32 6, %v4728_v10 }
 0x1f6   :  { %v1080_v7 = vmax.f32 %v1069_v3, 0.0  ;;  %v4332_v62 = vld [vmem:[#allocation8 + $0x760] ss:$16 sps:$4 sm:$0xff]   ;;  %v4340_v1 = vld [vmem:[#allocation8 + $0x784] ss:$16 sps:$4 sm:$0xff]  }
 0x1f7   :  { %v4341_v3 = vld [vmem:[#allocation8 + $0x788] ss:$16 sps:$4 sm:$0xff]   ;;  %v4344_v6 = vld [vmem:[#allocation8 + $0x7a0] ss:$16 sps:$4 sm:$0xff]  }
 0x1f8   :  { %2760 = vmatpush1.bf16.msra.mxu0 %v4260_v17  ;;  %2924 = vmatpush1.bf16.msra.mxu1 %v4263_v2  ;;  %v1088_v19 = vpack.c.bf16 %v1080_v7, %v1080_v7  ;;  %v4343_v17 = vld [vmem:[#allocation8 + $0x78c] ss:$16 sps:$4 sm:$0xff]   ;;  %v4338_v2 = vld [vmem:[#allocation8 + $0x780] ss:$16 sps:$4 sm:$0xff]   ;;  %v4347_v7 = vld [vmem:[#allocation8 + $0x7a8] ss:$16 sps:$4 sm:$0xff]  }
 0x1f9   :  { %2770 = vmatprep.subr.bf16.mxu0 %v4268_v4  ;;  %2934 = vmatprep.subr.bf16.mxu1 %v4271_v5  ;;  %v4346_v4 = vld [vmem:[#allocation8 + $0x7a4] ss:$16 sps:$4 sm:$0xff]   ;;  %v4349_v5 = vld [vmem:[#allocation8 + $0x7ac] ss:$16 sps:$4 sm:$0xff]   ;;  %v3047_v10 = vld [vmem:[%s4808_s6] sm:$0x3] }
 0x1fb   :  { %2762 = vmatmul.mubr.bf16.vlgmr.msra.gmra.mrb[4].mxu0 %v1085_v8  ;;  %2926 = vmatmul.mubr.bf16.vlgmr.msra.gmra.mrb[12].mxu1 %v1085_v8  ;;  %v249_v8 = vrot.slane %v4733_v12, %v248_v46  ;;  %v4364_v12 = vld [vmem:[#allocation10 + $0x4] ss:$8 sps:$4 sm:$0xff]  }
 0x1fc   :  { %2771 = vmatpush1.bf16.msra.mxu0 %v4266_v9  ;;  %2935 = vmatpush1.bf16.msra.mxu1 %v4269_v14  ;;  %v4352_v9 = vld [vmem:[#allocation8 + $0x7c4] ss:$16 sps:$4 sm:$0xff]   ;;  %v4355_v14 = vld [vmem:[#allocation8 + $0x7cc] ss:$16 sps:$4 sm:$0xff]  }
 0x1fd   :  { %2772 = vmatprep.subr.bf16.mxu0 %v4274_v15  ;;  %2936 = vmatprep.subr.bf16.mxu1 %v4277_v16  ;;  %v4350_v15 = vld [vmem:[#allocation8 + $0x7c0] ss:$16 sps:$4 sm:$0xff]   ;;  %v4353_v16 = vld [vmem:[#allocation8 + $0x7c8] ss:$16 sps:$4 sm:$0xff]  }
 0x1fe   :  { %2802 = vmatprep.mubr.bf16.mxu0 %v1088_v19  ;;  %2966 = vmatprep.mubr.bf16.mxu1 %v1088_v19  ;;  %v1067_v19 = vadd.f32 %v4762_v63, %v249_v8  ;;  %v4365_v63 = vld [vmem:[#allocation10 + $0x10] ss:$8 sps:$4 sm:$0xff]  }
 0x200   :  { %2773 = vmatpush1.bf16.msra.mxu0 %v4272_v20  ;;  %2937 = vmatpush1.bf16.msra.mxu1 %v4275_v21  ;;  %v4358_v20 = vld [vmem:[#allocation8 + $0x7e4] ss:$16 sps:$4 sm:$0xff]   ;;  %v4361_v21 = vld [vmem:[#allocation8 + $0x7ec] ss:$16 sps:$4 sm:$0xff]  }
 0x201   :  { %2774 = vmatprep.subr.bf16.mxu0 %v4280_v22  ;;  %2938 = vmatprep.subr.bf16.mxu1 %v4283_v23  ;;  %v4356_v22 = vld [vmem:[#allocation8 + $0x7e0] ss:$16 sps:$4 sm:$0xff]   ;;  %v4359_v23 = vld [vmem:[#allocation8 + $0x7e8] ss:$16 sps:$4 sm:$0xff]  }
 0x204   :  { %2775 = vmatpush1.bf16.msra.mxu0 %v4278_v24  ;;  %2939 = vmatpush1.bf16.msra.mxu1 %v4281_v26  ;;  %v1079_v24 = vmax.f32 %v1067_v19, 0.0  ;;  %v4362_v26 = vld [vmem:[#allocation10] ss:$8 sps:$4 sm:$0xff]  }
 0x205   :  { %2776 = vmatprep.subr.bf16.mxu0 %v4286_v27  ;;  %2940 = vmatprep.subr.bf16.mxu1 %v4289_v29  ;;  %v4367_v29 = vld [vmem:[#allocation10 + $0x14] ss:$8 sps:$4 sm:$0xff]   ;;  %v4410_v19 = vld [vmem:[#allocation10 + $0x100] ss:$8 sps:$4 sm:$0xff]  }
 0x206   :  { %v1087_v27 = vpack.c.bf16 %v1079_v24, %v1079_v24  ;;  %v4416_v24 = vld [vmem:[#allocation10 + $0x120] ss:$8 sps:$4 sm:$0xff]  }
 0x208   :  { %2777 = vmatpush1.bf16.msra.mxu0 %v4284_v30  ;;  %2941 = vmatpush1.bf16.msra.mxu1 %v4287_v31  ;;  %v4370_v30 = vld [vmem:[#allocation10 + $0x24] ss:$8 sps:$4 sm:$0xff]   ;;  %v4368_v31 = vld [vmem:[#allocation10 + $0x20] ss:$8 sps:$4 sm:$0xff]  }
 0x209   :  { %2778 = vmatprep.subr.bf16.mxu0 %v4292_v32  ;;  %2942 = vmatprep.subr.bf16.mxu1 %v4295_v33  ;;  %v4373_v32 = vld [vmem:[#allocation10 + $0x34] ss:$8 sps:$4 sm:$0xff]   ;;  %v4371_v33 = vld [vmem:[#allocation10 + $0x30] ss:$8 sps:$4 sm:$0xff]  }
 0x20c   :  { %2779 = vmatpush1.bf16.msra.mxu0 %v4290_v34  ;;  %2943 = vmatpush1.bf16.msra.mxu1 %v4293_v35  ;;  %v4376_v34 = vld [vmem:[#allocation10 + $0x44] ss:$8 sps:$4 sm:$0xff]   ;;  %v4374_v35 = vld [vmem:[#allocation10 + $0x40] ss:$8 sps:$4 sm:$0xff]  }
 0x20d   :  { %2780 = vmatprep.subr.bf16.mxu0 %v4298_v36  ;;  %2944 = vmatprep.subr.bf16.mxu1 %v4301_v37  ;;  %v4379_v36 = vld [vmem:[#allocation10 + $0x54] ss:$8 sps:$4 sm:$0xff]   ;;  %v4377_v37 = vld [vmem:[#allocation10 + $0x50] ss:$8 sps:$4 sm:$0xff]  }
 0x210   :  { %2781 = vmatpush1.bf16.msra.mxu0 %v4296_v38  ;;  %2945 = vmatpush1.bf16.msra.mxu1 %v4299_v39  ;;  %v4382_v38 = vld [vmem:[#allocation10 + $0x64] ss:$8 sps:$4 sm:$0xff]   ;;  %v4380_v39 = vld [vmem:[#allocation10 + $0x60] ss:$8 sps:$4 sm:$0xff]  }
 0x211   :  { %2782 = vmatprep.subr.bf16.mxu0 %v4304_v40  ;;  %2946 = vmatprep.subr.bf16.mxu1 %v4307_v41  ;;  %v4385_v40 = vld [vmem:[#allocation10 + $0x74] ss:$8 sps:$4 sm:$0xff]   ;;  %v4383_v41 = vld [vmem:[#allocation10 + $0x70] ss:$8 sps:$4 sm:$0xff]  }
 0x214   :  { %2783 = vmatpush1.bf16.msra.mxu0 %v4302_v42  ;;  %2947 = vmatpush1.bf16.msra.mxu1 %v4305_v43  ;;  %v4388_v42 = vld [vmem:[#allocation10 + $0x84] ss:$8 sps:$4 sm:$0xff]   ;;  %v4386_v43 = vld [vmem:[#allocation10 + $0x80] ss:$8 sps:$4 sm:$0xff]  }
 0x215   :  { %2784 = vmatprep.subr.bf16.mxu0 %v4310_v44  ;;  %2948 = vmatprep.subr.bf16.mxu1 %v4313_v45  ;;  %v4391_v44 = vld [vmem:[#allocation10 + $0x94] ss:$8 sps:$4 sm:$0xff]   ;;  %v4389_v45 = vld [vmem:[#allocation10 + $0x90] ss:$8 sps:$4 sm:$0xff]  }
 0x218   :  { %2785 = vmatpush1.bf16.msra.mxu0 %v4308_v47  ;;  %2949 = vmatpush1.bf16.msra.mxu1 %v4311_v48  ;;  %v4394_v47 = vld [vmem:[#allocation10 + $0xa4] ss:$8 sps:$4 sm:$0xff]   ;;  %v4392_v48 = vld [vmem:[#allocation10 + $0xa0] ss:$8 sps:$4 sm:$0xff]  }
 0x219   :  { %2786 = vmatprep.subr.bf16.mxu0 %v4316_v50  ;;  %2950 = vmatprep.subr.bf16.mxu1 %v4319_v51  ;;  %v4397_v50 = vld [vmem:[#allocation10 + $0xb4] ss:$8 sps:$4 sm:$0xff]   ;;  %v4395_v51 = vld [vmem:[#allocation10 + $0xb0] ss:$8 sps:$4 sm:$0xff]  }
 0x21c   :  { %2787 = vmatpush1.bf16.msra.mxu0 %v4314_v52  ;;  %2951 = vmatpush1.bf16.msra.mxu1 %v4317_v53  ;;  %v4400_v52 = vld [vmem:[#allocation10 + $0xc4] ss:$8 sps:$4 sm:$0xff]   ;;  %v4398_v53 = vld [vmem:[#allocation10 + $0xc0] ss:$8 sps:$4 sm:$0xff]  }
 0x21d   :  { %2788 = vmatprep.subr.bf16.mxu0 %v4322_v55  ;;  %2952 = vmatprep.subr.bf16.mxu1 %v4325_v49  ;;  %v4403_v55 = vld [vmem:[#allocation10 + $0xd4] ss:$8 sps:$4 sm:$0xff]   ;;  %v4401_v49 = vld [vmem:[#allocation10 + $0xd0] ss:$8 sps:$4 sm:$0xff]  }
 0x220   :  { %2789 = vmatpush1.bf16.msra.mxu0 %v4320_v54  ;;  %2953 = vmatpush1.bf16.msra.mxu1 %v4323_v56  ;;  %v4406_v54 = vld [vmem:[#allocation10 + $0xe4] ss:$8 sps:$4 sm:$0xff]   ;;  %v4404_v56 = vld [vmem:[#allocation10 + $0xe0] ss:$8 sps:$4 sm:$0xff]  }
 0x221   :  { %2790 = vmatprep.subr.bf16.mxu0 %v4328_v18  ;;  %2954 = vmatprep.subr.bf16.mxu1 %v4331_v57  ;;  %v4409_v18 = vld [vmem:[#allocation10 + $0xf4] ss:$8 sps:$4 sm:$0xff]   ;;  %v4407_v57 = vld [vmem:[#allocation10 + $0xf0] ss:$8 sps:$4 sm:$0xff]  }
 0x224   :  { %2791 = vmatpush1.bf16.msra.mxu0 %v4326_v58  ;;  %2955 = vmatpush1.bf16.msra.mxu1 %v4329_v59  ;;  %v4412_v58 = vld [vmem:[#allocation10 + $0x104] ss:$8 sps:$4 sm:$0xff]   ;;  %v4770_v59 = vld [vmem:[%s4806_s4] sm:$0xf] }
 0x225   :  { %2792 = vmatprep.subr.bf16.mxu0 %v4334_v60  ;;  %2956 = vmatprep.subr.bf16.mxu1 %v4337_v61  ;;  %v1350_v60 = vrot.slane %v4770_v59, %v4731_v11  ;;  %v1354_v61 = vrot.slane %v4770_v59, %v4736_v13 }
 0x228   :  { %2793 = vmatpush1.bf16.msra.mxu0 %v4332_v62  ;;  %2957 = vmatpush1.bf16.msra.mxu1 %v4335_v0  ;;  %v1362_v62 = vrot.slane %v4770_v59, %v236_v28 }
 0x229   :  { %2794 = vmatprep.subr.bf16.mxu0 %v4340_v1  ;;  %2958 = vmatprep.subr.bf16.mxu1 %v4343_v17 }
 0x22c   :  { %2795 = vmatpush1.bf16.msra.mxu0 %v4338_v2  ;;  %2959 = vmatpush1.bf16.msra.mxu1 %v4341_v3 }
 0x22d   :  { %2796 = vmatprep.subr.bf16.mxu0 %v4346_v4  ;;  %2960 = vmatprep.subr.bf16.mxu1 %v4349_v5 }
 0x230   :  { %2797 = vmatpush1.bf16.msra.mxu0 %v4344_v6  ;;  %2961 = vmatpush1.bf16.msra.mxu1 %v4347_v7 }
 0x231   :  { %2798 = vmatprep.subr.bf16.mxu0 %v4352_v9  ;;  %2962 = vmatprep.subr.bf16.mxu1 %v4355_v14 }
 0x234   :  { %2799 = vmatpush1.bf16.msra.mxu0 %v4350_v15  ;;  %2963 = vmatpush1.bf16.msra.mxu1 %v4353_v16 }
 0x235   :  { %2800 = vmatprep.subr.bf16.mxu0 %v4358_v20  ;;  %2964 = vmatprep.subr.bf16.mxu1 %v4361_v21  ;;  %v4415_v21 = vld [vmem:[#allocation10 + $0x114] ss:$8 sps:$4 sm:$0xff]  }
 0x238   :  { %2801 = vmatpush1.bf16.msra.mxu0 %v4356_v22  ;;  %2965 = vmatpush1.bf16.msra.mxu1 %v4359_v23  ;;  %v4413_v22 = vld [vmem:[#allocation10 + $0x110] ss:$8 sps:$4 sm:$0xff]   ;;  %v4418_v23 = vld [vmem:[#allocation10 + $0x124] ss:$8 sps:$4 sm:$0xff]  }
 0x239   :  { %3379 = vmatprep.subr.bf16.mxu0 %v4364_v12  ;;  %v4421_v12 = vld [vmem:[#allocation10 + $0x134] ss:$8 sps:$4 sm:$0xff]  }
 0x23b   :  { %2803 = vmatmul.mubr.bf16.vlgmr.msra.gmra.mrb[4].mxu0 %v1087_v27  ;;  %2967 = vmatmul.mubr.bf16.vlgmr.msra.gmra.mrb[12].mxu1 %v1087_v27  ;;  %v4424_v27 = vld [vmem:[#allocation10 + $0x144] ss:$8 sps:$4 sm:$0xff]  }
 0x23c   :  { %3380 = vmatpush1.bf16.msra.mxu0 %v4362_v26  ;;  %v4419_v26 = vld [vmem:[#allocation10 + $0x130] ss:$8 sps:$4 sm:$0xff]  }
 0x23d   :  { %3381 = vmatprep.subr.bf16.mxu0 %v4367_v29  ;;  %v4422_v29 = vld [vmem:[#allocation10 + $0x140] ss:$8 sps:$4 sm:$0xff]  }
 0x240   :  { %3382 = vmatpush1.bf16.msra.mxu0 %v4365_v63  ;;  %v4427_v63 = vld [vmem:[#allocation10 + $0x154] ss:$8 sps:$4 sm:$0xff]  }
 0x241   :  { %3383 = vmatprep.subr.bf16.mxu0 %v4370_v30  ;;  %v4425_v30 = vld [vmem:[#allocation10 + $0x150] ss:$8 sps:$4 sm:$0xff]  }
 0x244   :  { %3384 = vmatpush1.bf16.msra.mxu0 %v4368_v31  ;;  %v4430_v31 = vld [vmem:[#allocation10 + $0x164] ss:$8 sps:$4 sm:$0xff]  }
 0x245   :  { %3385 = vmatprep.subr.bf16.mxu0 %v4373_v32  ;;  %v4428_v32 = vld [vmem:[#allocation10 + $0x160] ss:$8 sps:$4 sm:$0xff]  }
 0x248   :  { %3386 = vmatpush1.bf16.msra.mxu0 %v4371_v33  ;;  %v4433_v33 = vld [vmem:[#allocation10 + $0x174] ss:$8 sps:$4 sm:$0xff]  }
 0x249   :  { %3387 = vmatprep.subr.bf16.mxu0 %v4376_v34  ;;  %v4431_v34 = vld [vmem:[#allocation10 + $0x170] ss:$8 sps:$4 sm:$0xff]  }
 0x24c   :  { %3388 = vmatpush1.bf16.msra.mxu0 %v4374_v35  ;;  %v4436_v35 = vld [vmem:[#allocation10 + $0x184] ss:$8 sps:$4 sm:$0xff]  }
 0x24d   :  { %3389 = vmatprep.subr.bf16.mxu0 %v4379_v36  ;;  %v4434_v36 = vld [vmem:[#allocation10 + $0x180] ss:$8 sps:$4 sm:$0xff]  }
 0x250   :  { %3390 = vmatpush1.bf16.msra.mxu0 %v4377_v37  ;;  %v4439_v37 = vld [vmem:[#allocation10 + $0x194] ss:$8 sps:$4 sm:$0xff]  }
 0x251   :  { %3391 = vmatprep.subr.bf16.mxu0 %v4382_v38  ;;  %v4437_v38 = vld [vmem:[#allocation10 + $0x190] ss:$8 sps:$4 sm:$0xff]  }
 0x254   :  { %3392 = vmatpush1.bf16.msra.mxu0 %v4380_v39  ;;  %v4442_v39 = vld [vmem:[#allocation10 + $0x1a4] ss:$8 sps:$4 sm:$0xff]  }
 0x255   :  { %3393 = vmatprep.subr.bf16.mxu0 %v4385_v40  ;;  %v4440_v40 = vld [vmem:[#allocation10 + $0x1a0] ss:$8 sps:$4 sm:$0xff]  }
 0x258   :  { %3394 = vmatpush1.bf16.msra.mxu0 %v4383_v41  ;;  %v4445_v41 = vld [vmem:[#allocation10 + $0x1b4] ss:$8 sps:$4 sm:$0xff]  }
 0x259   :  { %3395 = vmatprep.subr.bf16.mxu0 %v4388_v42  ;;  %v4443_v42 = vld [vmem:[#allocation10 + $0x1b0] ss:$8 sps:$4 sm:$0xff]  }
 0x25c   :  { %3396 = vmatpush1.bf16.msra.mxu0 %v4386_v43  ;;  %v4448_v43 = vld [vmem:[#allocation10 + $0x1c4] ss:$8 sps:$4 sm:$0xff]  }
 0x25d   :  { %3397 = vmatprep.subr.bf16.mxu0 %v4391_v44  ;;  %v4446_v44 = vld [vmem:[#allocation10 + $0x1c0] ss:$8 sps:$4 sm:$0xff]  }
 0x260   :  { %3398 = vmatpush1.bf16.msra.mxu0 %v4389_v45  ;;  %v4451_v45 = vld [vmem:[#allocation10 + $0x1d4] ss:$8 sps:$4 sm:$0xff]  }
 0x261   :  { %3399 = vmatprep.subr.bf16.mxu0 %v4394_v47  ;;  %v4449_v47 = vld [vmem:[#allocation10 + $0x1d0] ss:$8 sps:$4 sm:$0xff]  }
 0x264   :  { %3400 = vmatpush1.bf16.msra.mxu0 %v4392_v48  ;;  %v1358_v48 = vrot.slane %v4770_v59, %v232_v25  ;;  %v3052_v25 = vrot.slane %v3047_v10, %v4731_v11 }
 0x265   :  { %3401 = vmatprep.subr.bf16.mxu0 %v4397_v50  ;;  %v4454_v50 = vld [vmem:[#allocation10 + $0x1e4] ss:$8 sps:$4 sm:$0xff]  }
 0x268   :  { %3402 = vmatpush1.bf16.msra.mxu0 %v4395_v51  ;;  %v4452_v51 = vld [vmem:[#allocation10 + $0x1e0] ss:$8 sps:$4 sm:$0xff]  }
 0x269   :  { %3403 = vmatprep.subr.bf16.mxu0 %v4400_v52 }
 0x26c   :  { %3404 = vmatpush1.bf16.msra.mxu0 %v4398_v53  ;;  %v4457_v53 = vld [vmem:[#allocation10 + $0x1f4] ss:$8 sps:$4 sm:$0xff]  }
 0x26d   :  { %3405 = vmatprep.subr.bf16.mxu0 %v4403_v55  ;;  %v4455_v55 = vld [vmem:[#allocation10 + $0x1f0] ss:$8 sps:$4 sm:$0xff]  }
 0x270   :  { %3406 = vmatpush1.bf16.msra.mxu0 %v4401_v49 }
 0x271   :  { %3407 = vmatprep.subr.bf16.mxu0 %v4406_v54 }
 0x274   :  { %3408 = vmatpush1.bf16.msra.mxu0 %v4404_v56  ;;  %v3056_v56 = vrot.slane %v3047_v10, %v4736_v13 }
 0x275   :  { %3409 = vmatprep.subr.bf16.mxu0 %v4409_v18 }
 0x278   :  { %3410 = vmatpush1.bf16.msra.mxu0 %v4407_v57 }
 0x279   :  { %3420 = vmatprep.subr.bf16.mxu0 %v4412_v58 }
 0x30e   :  { %v2804_v0 = vpop.f32.mrb[4].mxu0  ;;  %v4779_v1 = vpop.f32.mrb[12].mxu1 }
 0x30f   :  { %v3930_v17 = vadd.f32 %v2804_v0, %v1350_v60  ;;  %v2806_v2 = vpop.f32.mrb[5].mxu0  ;;  %v2970_v3 = vpop.f32.mrb[13].mxu1  ;;  %v3932_v52 = vadd.f32 %v4779_v1, %v1358_v48 }
 0x310   :  { %v3931_v46 = vadd.f32 %v2806_v2, %v1354_v61  ;;  %v3933_v4 = vadd.f32 %v2970_v3, %v1362_v62  ;;  %v2808_v5 = vpop.f32.mrb[6].mxu0  ;;  %v2972_v6 = vpop.f32.mrb[14].mxu1 }
 0x311   :  { %v2975_v7 = vmax.f32 %v3930_v17, 0.0  ;;  %v2809_v8 = vpop.f32.mrb[7].mxu0  ;;  %v2973_v9 = vpop.f32.mrb[15].mxu1  ;;  %v2977_v49 = vmax.f32 %v3932_v52, 0.0 }
 0x312   :  { %v2976_v14 = vmax.f32 %v3931_v46, 0.0  ;;  %v2978_v15 = vmax.f32 %v3933_v4, 0.0 }
 0x313   :  { %v2979_v20 = vpack.c.bf16 %v2975_v7, %v2975_v7  ;;  %v2981_v54 = vpack.c.bf16 %v2977_v49, %v2977_v49 }
 0x314   :  { %v2980_v16 = vpack.c.bf16 %v2976_v14, %v2976_v14  ;;  %v2982_v28 = vpack.c.bf16 %v2978_v15, %v2978_v15 }
 0x316   :  { %3411 = vmatprep.mubr.bf16.mxu0 %v2980_v16 }
 0x317   :  { %3412 = vmatmul.mubr.bf16.vlgmr.msra.gmra.mrb[8].mxu0 %v2979_v20 }
 0x318   :  { %3421 = vmatpush1.bf16.msra.mxu0 %v4410_v19  ;;  %3452 = vmatprep.mubr.bf16.mxu0 %v2982_v28 }
 0x319   :  { %3422 = vmatprep.subr.bf16.mxu0 %v4415_v21 }
 0x31c   :  { %3423 = vmatpush1.bf16.msra.mxu0 %v4413_v22 }
 0x31d   :  { %3424 = vmatprep.subr.bf16.mxu0 %v4418_v23 }
 0x320   :  { %3425 = vmatpush1.bf16.msra.mxu0 %v4416_v24 }
 0x321   :  { %3426 = vmatprep.subr.bf16.mxu0 %v4421_v12 }
 0x324   :  { %3427 = vmatpush1.bf16.msra.mxu0 %v4419_v26 }
 0x325   :  { %3428 = vmatprep.subr.bf16.mxu0 %v4424_v27 }
 0x328   :  { %3429 = vmatpush1.bf16.msra.mxu0 %v4422_v29 }
 0x329   :  { %3430 = vmatprep.subr.bf16.mxu0 %v4427_v63 }
 0x32c   :  { %3431 = vmatpush1.bf16.msra.mxu0 %v4425_v30 }
 0x32d   :  { %3432 = vmatprep.subr.bf16.mxu0 %v4430_v31 }
 0x330   :  { %3433 = vmatpush1.bf16.msra.mxu0 %v4428_v32 }
 0x331   :  { %3434 = vmatprep.subr.bf16.mxu0 %v4433_v33 }
 0x334   :  { %3435 = vmatpush1.bf16.msra.mxu0 %v4431_v34 }
 0x335   :  { %3436 = vmatprep.subr.bf16.mxu0 %v4436_v35 }
 0x338   :  { %3437 = vmatpush1.bf16.msra.mxu0 %v4434_v36 }
 0x339   :  { %3438 = vmatprep.subr.bf16.mxu0 %v4439_v37 }
 0x33c   :  { %3439 = vmatpush1.bf16.msra.mxu0 %v4437_v38 }
 0x33d   :  { %3440 = vmatprep.subr.bf16.mxu0 %v4442_v39 }
 0x340   :  { %3441 = vmatpush1.bf16.msra.mxu0 %v4440_v40 }
 0x341   :  { %3442 = vmatprep.subr.bf16.mxu0 %v4445_v41 }
 0x344   :  { %3443 = vmatpush1.bf16.msra.mxu0 %v4443_v42 }
 0x345   :  { %3444 = vmatprep.subr.bf16.mxu0 %v4448_v43 }
 0x348   :  { %3445 = vmatpush1.bf16.msra.mxu0 %v4446_v44 }
 0x349   :  { %3446 = vmatprep.subr.bf16.mxu0 %v4451_v45 }
 0x34c   :  { %3447 = vmatpush1.bf16.msra.mxu0 %v4449_v47 }
 0x34d   :  { %3448 = vmatprep.subr.bf16.mxu0 %v4454_v50 }
 0x350   :  { %3449 = vmatpush1.bf16.msra.mxu0 %v4452_v51 }
 0x351   :  { %3450 = vmatprep.subr.bf16.mxu0 %v4457_v53 }
 0x354   :  { %3451 = vmatpush1.bf16.msra.mxu0 %v4455_v55 }
 0x357   :  { %3453 = vmatmul.mubr.bf16.vlgmr.msra.gmra.mrb[8].mxu0 %v2981_v54 }
 0x42a   :  { %v3454_v18 = vpop.f32.mrb[8].mxu0 }
 0x42b   :  { %v3934_v57 = vadd.f32 %v3454_v18, %v3052_v25  ;;  %v3456_v58 = vpop.f32.mrb[9].mxu0 }
 0x42c   :  { %v3935_v59 = vadd.f32 %v3456_v58, %v3056_v56  ;;  %v3458_v60 = vpop.f32.mrb[10].mxu0 }
 0x42d   :  { %3461 = vst [vmem:[#allocation11] sm:$0xff] %v3934_v57  ;;  %v3459_v61 = vpop.f32.mrb[11].mxu0 }
 0x42e   :  { %3462 = vst [vmem:[#allocation11 + $0x8] sm:$0xff] %v3935_v59 }
 0x42f   :  { %4579 = shalt.err (!%p4576_p2)
}
 0x430   :  { %s4580_s21 = scalar_lea.hbm %s4809_s7, 256 }
 0x431   :  { %p4581_p3 = scmp.ne.s32.totalorder %s4809_s7, %s4580_s21  ;;  %p4584_p4 = scmp.lt.u32.totalorder %s4580_s21, %s4809_s7 }
 0x433   :  { %p4586_p5 = pnand %p4584_p4, %p4581_p3 }
 0x435   :  { %4589 = shalt.err (!%p4586_p5)
}
 0x436   :  { %3472 = dma.vmem_to_hbm [thread:$0]  %s3470_s18, 256, %s4809_s7, [#allocation4]  }
 0x437   :  { %4596 = dma.done.wait [#allocation4], 256  }
 0x438   :  { %4597 = vsyncadd [#allocation4], 4294967040 }
 0x439   :  { %3476 = vsyncpa [#allocation3], 1 }
 0x43a   :  { %3477 = vsyncpa [#allocation6], 1 }
 0x43b   :  { %3478 = vsyncpa [#allocation9], 1 }
 0x43c   :  { %3479 = vsyncpa [#allocation4], 1 }

</bundles_post_ra>
